<compile_context>
chip_gen: v7x
topology: tpu7x:2x2x1
jax: 0.10.0
libtpu: 0.0.40
codegen_flags: <defaults>
</compile_context>

<pallas_src>
import math
import functools

import jax
import jax.numpy as jnp
from jax.experimental import pallas as pl
from jax.experimental.pallas import tpu as pltpu

LN_EPS = 1e-12  # BertLayerNorm eps


def _default_vmem_limit():
    # Per-generation scoped-VMEM budget (review: ~56 MiB on v7x, 64-100 MiB on
    # v5e/v6e).  Falls back to a value that is safe on every generation.
    try:
        cap = pltpu.get_tpu_info().vmem_capacity_bytes
        return int(min(cap * 7 // 8, 100 * 1024 * 1024))
    except Exception:
        return 56 * 1024 * 1024


VMEM_LIMIT = _default_vmem_limit()


def _gelu(x):
    # exact (erf-based) GELU, matching UniLM's gelu()
    return x * 0.5 * (1.0 + jax.lax.erf(x / math.sqrt(2.0)))


def _layernorm(x, g, b):
    mu = jnp.mean(x, axis=-1, keepdims=True)
    var = jnp.mean(jnp.square(x - mu), axis=-1, keepdims=True)
    return (x - mu) * jax.lax.rsqrt(var + LN_EPS) * g + b


# ----------------------------------------------------------------------------
# Fused encoder kernel: grid over layers, hidden state carried in VMEM scratch
# ----------------------------------------------------------------------------
def fused_layers_kernel(h_ref, m_ref,
                        wqkv, bqkv, wo, bo, ln1_g, ln1_b,
                        wi, bi, wf, bff, ln2_g, ln2_b,
                        out_ref, hcarry, ctx,
                        *, num_heads, head_dim, batch, seq):
    l = pl.program_id(0)
    num_layers = pl.num_programs(0)
    H = num_heads * head_dim

    # Load embeddings into the resident carry at the first layer only.
    @pl.when(l == 0)
    def _():
        for b in range(batch):
            hcarry[b * seq:(b + 1) * seq, :] = h_ref[b]

    h = hcarry[...]                                   # (B*S, H) bf16

    # Fused QKV projection: one wide bf16 MXU matmul, f32 accumulation.
    # (1/sqrt(head_dim) is folded into the query third of wqkv/bqkv offline.)
    qkv = jnp.dot(h, wqkv[0], preferred_element_type=jnp.float32) + bqkv[0]
    q = qkv[:, :H]
    k = qkv[:, H:2 * H]
    v = qkv[:, 2 * H:]

    # Multi-head attention per batch element; each head writes its context
    # slice directly into the bf16 VMEM scratch (no concatenate).  Dropout =
    # identity (eval mode).
    for b in range(batch):
        rs = slice(b * seq, (b + 1) * seq)
        mask_b = m_ref[b].astype(jnp.float32)          # (S, S) additive mask
        for hh in range(num_heads):
            cs = slice(hh * head_dim, (hh + 1) * head_dim)
            scores = jnp.dot(q[rs, cs], k[rs, cs].T,
                             preferred_element_type=jnp.float32) + mask_b
            scores = scores - jnp.max(scores, axis=-1, keepdims=True)
            p = jnp.exp(scores)
            p = p * pl.reciprocal(jnp.sum(p, axis=-1, keepdims=True),
                                  approx=True)
            ctx[rs, cs] = jnp.dot(p, v[rs, cs],
                                  preferred_element_type=jnp.float32
                                  ).astype(ctx.dtype)

    h32 = h.astype(jnp.float32)

    # BertSelfOutput: dense + residual + LayerNorm
    attn = jnp.dot(ctx[...], wo[0], preferred_element_type=jnp.float32) + bo[0]
    attn = _layernorm(attn + h32, ln1_g[0], ln1_b[0])

    # BertIntermediate (GELU) + BertOutput (+ residual LayerNorm)
    inter = _gelu(jnp.dot(attn.astype(h.dtype), wi[0],
                          preferred_element_type=jnp.float32) + bi[0])
    ffn = jnp.dot(inter.astype(h.dtype), wf[0],
                  preferred_element_type=jnp.float32) + bff[0]
    out = _layernorm(ffn + attn, ln2_g[0], ln2_b[0])

    hcarry[...] = out.astype(hcarry.dtype)

    # Write the final hidden state to HBM only after the last layer.
    @pl.when(l == num_layers - 1)
    def _():
        for b in range(batch):
            out_ref[b] = hcarry[b * seq:(b + 1) * seq, :]


def run_encoder(hidden, ext_mask, stacked_weights, num_heads):
    B, S, H = hidden.shape
    L = stacked_weights[0].shape[0]
    head_dim = H // num_heads

    kernel = functools.partial(fused_layers_kernel, num_heads=num_heads,
                               head_dim=head_dim, batch=B, seq=S)

    def weight_spec(arr):
        nd = arr.ndim
        return pl.BlockSpec((1,) + arr.shape[1:],
                            lambda l, nd=nd: (l,) + (0,) * (nd - 1))

    in_specs = ([pl.BlockSpec((B, S, H), lambda l: (0, 0, 0)),
                 pl.BlockSpec((B, S, S), lambda l: (0, 0, 0))]
                + [weight_spec(w) for w in stacked_weights])

    return pl.pallas_call(
        kernel,
        out_shape=jax.ShapeDtypeStruct((B, S, H), hidden.dtype),
        grid=(L,),
        in_specs=in_specs,
        out_specs=pl.BlockSpec((B, S, H), lambda l: (0, 0, 0)),
        scratch_shapes=[pltpu.VMEM((B * S, H), hidden.dtype),   # hidden carry
                        pltpu.VMEM((B * S, H), hidden.dtype)],  # attn context
        compiler_params=pltpu.CompilerParams(
            dimension_semantics=("arbitrary",),
            vmem_limit_bytes=VMEM_LIMIT),
    )(hidden, ext_mask, *stacked_weights)


# ----------------------------------------------------------------------------
# BertOnlyMLMHead: (1) tiny transform kernel  (2) vocab-tiled decoder kernel
# ----------------------------------------------------------------------------
def mlm_transform_kernel(x_ref, wt, bt, g, bln, out_ref):
    x = x_ref[...]                                               # (B, H) bf16
    t = jnp.dot(x, wt[...], preferred_element_type=jnp.float32) + bt[...]
    t = _layernorm(_gelu(t), g[...], bln[...])
    out_ref[...] = t.astype(out_ref.dtype)


def mlm_decoder_kernel(t_ref, wd, bd, out_ref):
    logits = jnp.dot(t_ref[...], wd[...],
                     preferred_element_type=jnp.float32) + bd[...]
    out_ref[...] = logits.astype(out_ref.dtype)


def run_mlm_head(x, wt, bt, g, bln, wd, bd, tile_v=4096):
    B, H = x.shape
    V = wd.shape[1]

    # 1) transform: computed once, not once per vocab tile.
    t = pl.pallas_call(
        mlm_transform_kernel,
        out_shape=jax.ShapeDtypeStruct((B, H), x.dtype),
        grid=(1,),
        in_specs=[pl.BlockSpec((B, H), lambda i: (0, 0)),
                  pl.BlockSpec((H, H), lambda i: (0, 0)),
                  pl.BlockSpec((1, H), lambda i: (0, 0)),
                  pl.BlockSpec((1, H), lambda i: (0, 0)),
                  pl.BlockSpec((1, H), lambda i: (0, 0))],
        out_specs=pl.BlockSpec((B, H), lambda i: (0, 0)),
        compiler_params=pltpu.CompilerParams(
            dimension_semantics=("arbitrary",),
            vmem_limit_bytes=VMEM_LIMIT),
    )(x, wt, bt, g, bln)

    # 2) tied decoder: stream (H, V) weight in lane-dense vocab tiles.
    tile_v = min(tile_v, V)
    n_tiles = pl.cdiv(V, tile_v)
    wd_spec = pl.BlockSpec((H, tile_v), lambda j: (0, j))
    if n_tiles >= 3:
        # extra buffering to smooth the pure HBM weight stream (v5e esp.)
        wd_spec = pl.BlockSpec((H, tile_v), lambda j: (0, j),
                               pipeline_mode=pl.Buffered(3))

    return pl.pallas_call(
        mlm_decoder_kernel,
        out_shape=jax.ShapeDtypeStruct((B, V), jnp.float32),
        grid=(n_tiles,),
        in_specs=[pl.BlockSpec((B, H), lambda j: (0, 0)),
                  wd_spec,
                  pl.BlockSpec((1, tile_v), lambda j: (0, j))],
        out_specs=pl.BlockSpec((B, tile_v), lambda j: (0, j)),
        compiler_params=pltpu.CompilerParams(
            dimension_semantics=("parallel",),
            vmem_limit_bytes=VMEM_LIMIT),
    )(t, wd, bd)


# ----------------------------------------------------------------------------
# Parameter init (deterministic, synthetic) — bf16 weights, f32 bias/LN,
# per-layer weights stacked with a leading L dim for the fused encoder kernel.
# ----------------------------------------------------------------------------
def init_params(key, cfg, param_dtype=jnp.bfloat16):
    V, H, I = cfg["vocab_size"], cfg["hidden_size"], cfg["intermediate_size"]
    P, T, L = cfg["max_position_embeddings"], cfg["type_vocab_size"], cfg["num_hidden_layers"]
    nh = cfg["num_attention_heads"]
    scale = 1.0 / math.sqrt(H // nh)

    def nrm(k, shape):
        return 0.02 * jax.random.normal(k, shape, dtype=jnp.float32)

    keys = jax.random.split(key, 4 + L)
    params = {
        "word_emb": nrm(keys[0], (V, H)).astype(param_dtype),
        "pos_emb": nrm(keys[1], (P, H)).astype(param_dtype),
        "tok_emb": nrm(keys[2], (T, H)).astype(param_dtype),
        "emb_ln_g": jnp.ones((1, H), jnp.float32),
        "emb_ln_b": jnp.zeros((1, H), jnp.float32),
    }

    layers = []
    for li in range(L):
        k = jax.random.split(keys[3 + li], 6)
        wq, wk, wv = nrm(k[0], (H, H)), nrm(k[1], (H, H)), nrm(k[2], (H, H))
        bq = jnp.zeros((H,), jnp.float32)
        bk = jnp.zeros((H,), jnp.float32)
        bv = jnp.zeros((H,), jnp.float32)
        # Fuse Q|K|V and fold the attention scale into the query block.
        wqkv = jnp.concatenate([wq * scale, wk, wv], axis=1).astype(param_dtype)
        bqkv = jnp.concatenate([bq * scale, bk, bv])[None, :].astype(jnp.float32)
        layers.append((
            wqkv, bqkv,                                                         # fused QKV
            nrm(k[3], (H, H)).astype(param_dtype), jnp.zeros((1, H), jnp.float32),  # wo, bo
            jnp.ones((1, H), jnp.float32), jnp.zeros((1, H), jnp.float32),          # LN1
            nrm(k[4], (H, I)).astype(param_dtype), jnp.zeros((1, I), jnp.float32),  # wi, bi
            nrm(k[5], (I, H)).astype(param_dtype), jnp.zeros((1, H), jnp.float32),  # wf, bff
            jnp.ones((1, H), jnp.float32), jnp.zeros((1, H), jnp.float32),          # LN2
        ))
    # Stack per-position across layers -> tuple of arrays with leading L dim.
    params["layers"] = tuple(jnp.stack(ws, axis=0) for ws in zip(*layers))

    kh = jax.random.split(keys[3 + L], 2)
    params["cls_wt"] = nrm(kh[0], (H, H)).astype(param_dtype)   # transform dense
    params["cls_bt"] = jnp.zeros((1, H), jnp.float32)
    params["cls_g"] = jnp.ones((1, H), jnp.float32)             # transform LayerNorm
    params["cls_b"] = jnp.zeros((1, H), jnp.float32)
    # tie_weights: decoder weight == word_embeddings  (W_dec = word_emb.T)
    params["decoder_w"] = params["word_emb"].T                  # (H, V) bf16
    params["decoder_b"] = jnp.zeros((1, V), jnp.float32)
    return params


# ----------------------------------------------------------------------------
# Full forward: UnilmForSeq2SeqDecodeSample.forward
# ----------------------------------------------------------------------------
def unilm_decode_forward(params, input_ids, token_type_ids, attention_mask, cfg):
    B, S = input_ids.shape

    # BertEmbeddings (gather + sum + LayerNorm; dropout = identity in eval)
    positions = jnp.arange(S)[None, :]
    emb = (params["word_emb"][input_ids].astype(jnp.float32)
           + params["pos_emb"][positions].astype(jnp.float32)
           + params["tok_emb"][token_type_ids].astype(jnp.float32))
    emb = _layernorm(emb, params["emb_ln_g"], params["emb_ln_b"])
    hidden = emb.astype(params["word_emb"].dtype)        # bf16 activations

    # get_extended_attention_mask: (1 - mask) * -10000, kept f32 (not exactly
    # representable in bf16).
    if attention_mask.ndim == 2:
        ext = jnp.broadcast_to(attention_mask[:, None, :], (B, S, S))
    elif attention_mask.ndim == 3:
        ext = attention_mask
    else:
        raise NotImplementedError
    ext = (1.0 - ext.astype(jnp.float32)) * -10000.0

    # All L BertLayers in one fused pallas_call (weights streamed per layer).
    hidden = run_encoder(hidden, ext, params["layers"],
                         cfg["num_attention_heads"])

    # sequence_output[:, -1:, :] -> MLM head (tied decoder, vocab-tiled)
    last = hidden[:, -1, :]                              # (B, H)
    scores = run_mlm_head(last,
                          params["cls_wt"], params["cls_bt"],
                          params["cls_g"], params["cls_b"],
                          params["decoder_w"], params["decoder_b"])
    return scores[:, None, :]                            # (B, 1, vocab) f32


if __name__ == "__main__":
    cfg = dict(
        vocab_size=128,
        hidden_size=32,
        num_attention_heads=4,
        num_hidden_layers=2,
        intermediate_size=64,
        max_position_embeddings=64,
        type_vocab_size=2,
    )
    B, S = 2, 8

    key = jax.random.PRNGKey(0)
    k_param, k_ids = jax.random.split(key)
    params = init_params(k_param, cfg)

    input_ids = jax.random.randint(k_ids, (B, S), 0, cfg["vocab_size"], dtype=jnp.int32)
    token_type_ids = jnp.concatenate(
        [jnp.zeros((B, S // 2), jnp.int32), jnp.ones((B, S - S // 2), jnp.int32)], axis=1)
    # UniLM seq2seq-style (here: causal) 3-D attention mask
    attention_mask = jnp.broadcast_to(
        jnp.tril(jnp.ones((S, S), jnp.float32))[None], (B, S, S))

    out = unilm_decode_forward(params, input_ids, token_type_ids, attention_mask, cfg)
    jax.block_until_ready(out)
    assert out.shape == (B, 1, cfg["vocab_size"])
    print("KERNEL_OK")
</pallas_src>

<mosaic_0001>
module attributes {stable_mosaic.version = 11 : i64} {
  func.func @fused_layers_kernel(%arg0: i32, %arg1: memref<2x8x32xbf16, #tpu.memory_space<vmem>>, %arg2: memref<2x8x8xf32, #tpu.memory_space<vmem>>, %arg3: memref<1x32x96xbf16, #tpu.memory_space<vmem>>, %arg4: memref<1x1x96xf32, #tpu.memory_space<vmem>>, %arg5: memref<1x32x32xbf16, #tpu.memory_space<vmem>>, %arg6: memref<1x1x32xf32, #tpu.memory_space<vmem>>, %arg7: memref<1x1x32xf32, #tpu.memory_space<vmem>>, %arg8: memref<1x1x32xf32, #tpu.memory_space<vmem>>, %arg9: memref<1x32x64xbf16, #tpu.memory_space<vmem>>, %arg10: memref<1x1x64xf32, #tpu.memory_space<vmem>>, %arg11: memref<1x64x32xbf16, #tpu.memory_space<vmem>>, %arg12: memref<1x1x32xf32, #tpu.memory_space<vmem>>, %arg13: memref<1x1x32xf32, #tpu.memory_space<vmem>>, %arg14: memref<1x1x32xf32, #tpu.memory_space<vmem>>, %arg15: memref<2x8x32xbf16, #tpu.memory_space<vmem>>, %arg16: memref<16x32xbf16, #tpu.memory_space<vmem>>, %arg17: memref<16x32xbf16, #tpu.memory_space<vmem>>) attributes {dimension_semantics = [#tpu.dimension_semantics<arbitrary>], iteration_bounds = array<i64: 2>, scalar_prefetch = 0 : i64, scratch_operands = 2 : i64, tpu.core_type = #tpu.core_type<tc>, window_params = [{pipeline_mode = #tpu.pipeline_mode<synchronous>, transform_indices = @transform_0, window_bounds = array<i64: 2, 8, 32>}, {pipeline_mode = #tpu.pipeline_mode<synchronous>, transform_indices = @transform_1, window_bounds = array<i64: 2, 8, 8>}, {transform_indices = @transform_2, window_bounds = array<i64: 1, 32, 96>}, {transform_indices = @transform_3, window_bounds = array<i64: 1, 1, 96>}, {transform_indices = @transform_4, window_bounds = array<i64: 1, 32, 32>}, {transform_indices = @transform_5, window_bounds = array<i64: 1, 1, 32>}, {transform_indices = @transform_6, window_bounds = array<i64: 1, 1, 32>}, {transform_indices = @transform_7, window_bounds = array<i64: 1, 1, 32>}, {transform_indices = @transform_8, window_bounds = array<i64: 1, 32, 64>}, {transform_indices = @transform_9, window_bounds = array<i64: 1, 1, 64>}, {transform_indices = @transform_10, window_bounds = array<i64: 1, 64, 32>}, {transform_indices = @transform_11, window_bounds = array<i64: 1, 1, 32>}, {transform_indices = @transform_12, window_bounds = array<i64: 1, 1, 32>}, {transform_indices = @transform_13, window_bounds = array<i64: 1, 1, 32>}, {pipeline_mode = #tpu.pipeline_mode<synchronous>, transform_indices = @transform_14, window_bounds = array<i64: 2, 8, 32>}]} {
    %c0_i32 = arith.constant 0 : i32
    %0 = arith.cmpi eq, %arg0, %c0_i32 : i32
    %1 = arith.extui %0 : i1 to i32
    %c0_i32_0 = arith.constant 0 : i32
    %2 = arith.cmpi ne, %1, %c0_i32_0 : i32
    scf.if %2 {
      %c0_109 = arith.constant 0 : index
      %c0_110 = arith.constant 0 : index
      %c0_111 = arith.constant 0 : index
      %262 = vector.load %arg1[%c0_109, %c0_110, %c0_111] : memref<2x8x32xbf16, #tpu.memory_space<vmem>>, vector<1x8x32xbf16>
      %263 = vector.shape_cast %262 : vector<1x8x32xbf16> to vector<8x32xbf16>
      %c0_112 = arith.constant 0 : index
      %c0_113 = arith.constant 0 : index
      %264 = vector.load %arg16[%c0_112, %c0_113] : memref<16x32xbf16, #tpu.memory_space<vmem>>, vector<8x32xbf16>
      tpu.vector_store %arg16[%c0_112, %c0_113], %263 {strides = array<i32>} : memref<16x32xbf16, #tpu.memory_space<vmem>>, vector<8x32xbf16>,
      %c1_114 = arith.constant 1 : index
      %c0_115 = arith.constant 0 : index
      %c0_116 = arith.constant 0 : index
      %265 = vector.load %arg1[%c1_114, %c0_115, %c0_116] : memref<2x8x32xbf16, #tpu.memory_space<vmem>>, vector<1x8x32xbf16>
      %266 = vector.shape_cast %265 : vector<1x8x32xbf16> to vector<8x32xbf16>
      %c8_117 = arith.constant 8 : index
      %c0_118 = arith.constant 0 : index
      %267 = vector.load %arg16[%c8_117, %c0_118] : memref<16x32xbf16, #tpu.memory_space<vmem>>, vector<8x32xbf16>
      tpu.vector_store %arg16[%c8_117, %c0_118], %266 {strides = array<i32>} : memref<16x32xbf16, #tpu.memory_space<vmem>>, vector<8x32xbf16>,
    } else {
    }
    %c0 = arith.constant 0 : index
    %c0_1 = arith.constant 0 : index
    %3 = vector.load %arg16[%c0, %c0_1] : memref<16x32xbf16, #tpu.memory_space<vmem>>, vector<16x32xbf16>
    %c0_2 = arith.constant 0 : index
    %c0_3 = arith.constant 0 : index
    %c0_4 = arith.constant 0 : index
    %4 = vector.load %arg3[%c0_2, %c0_3, %c0_4] : memref<1x32x96xbf16, #tpu.memory_space<vmem>>, vector<1x32x96xbf16>
    %5 = vector.shape_cast %4 : vector<1x32x96xbf16> to vector<32x96xbf16>
    %cst = arith.constant dense<0.000000e+00> : vector<16x96xf32>
    %6 = tpu.matmul %3, %5, %cst {dimension_numbers = #tpu.dot_dimension_numbers<[1], [0], [0], [1], [0, 0, 1, 1], [], []>} : vector<16x32xbf16>, vector<32x96xbf16>, vector<16x96xf32> -> vector<16x96xf32>
    %c0_5 = arith.constant 0 : index
    %c0_6 = arith.constant 0 : index
    %c0_7 = arith.constant 0 : index
    %7 = vector.load %arg4[%c0_5, %c0_6, %c0_7] : memref<1x1x96xf32, #tpu.memory_space<vmem>>, vector<1x1x96xf32>
    %8 = vector.shape_cast %7 : vector<1x1x96xf32> to vector<1x96xf32>
    %9 = vector.broadcast %8 : vector<1x96xf32> to vector<16x96xf32>
    %10 = arith.addf %6, %9 : vector<16x96xf32>
    %11 = vector.extract_strided_slice %10 {offsets = [0, 0], sizes = [16, 32], strides = [1, 1]} : vector<16x96xf32> to vector<16x32xf32>
    %12 = vector.extract_strided_slice %10 {offsets = [0, 32], sizes = [16, 32], strides = [1, 1]} : vector<16x96xf32> to vector<16x32xf32>
    %13 = vector.extract_strided_slice %10 {offsets = [0, 64], sizes = [16, 32], strides = [1, 1]} : vector<16x96xf32> to vector<16x32xf32>
    %c0_8 = arith.constant 0 : index
    %c0_9 = arith.constant 0 : index
    %c0_10 = arith.constant 0 : index
    %14 = vector.load %arg2[%c0_8, %c0_9, %c0_10] : memref<2x8x8xf32, #tpu.memory_space<vmem>>, vector<1x8x8xf32>
    %15 = vector.shape_cast %14 : vector<1x8x8xf32> to vector<8x8xf32>
    %16 = vector.extract_strided_slice %11 {offsets = [0, 0], sizes = [8, 8], strides = [1, 1]} : vector<16x32xf32> to vector<8x8xf32>
    %17 = vector.extract_strided_slice %12 {offsets = [0, 0], sizes = [8, 8], strides = [1, 1]} : vector<16x32xf32> to vector<8x8xf32>
    %18 = tpu.transpose %17, [1, 0] : vector<8x8xf32> -> vector<8x8xf32>
    %cst_11 = arith.constant dense<0.000000e+00> : vector<8x8xf32>
    %19 = tpu.matmul %16, %18, %cst_11 {dimension_numbers = #tpu.dot_dimension_numbers<[1], [0], [0], [1], [0, 0, 1, 1], [], []>} : vector<8x8xf32>, vector<8x8xf32>, vector<8x8xf32> -> vector<8x8xf32>
    %20 = arith.addf %19, %15 : vector<8x8xf32>
    %cst_12 = arith.constant dense<0xFF800000> : vector<8xf32>
    %21 = vector.multi_reduction <maximumf>, %20, %cst_12 [1] : vector<8x8xf32> to vector<8xf32>
    %22 = vector.shape_cast %21 : vector<8xf32> to vector<8x1xf32>
    %23 = vector.broadcast %22 : vector<8x1xf32> to vector<8x8xf32>
    %24 = arith.subf %20, %23 : vector<8x8xf32>
    %25 = math.exp %24 : vector<8x8xf32>
    %cst_13 = arith.constant dense<0.000000e+00> : vector<8xf32>
    %26 = vector.multi_reduction <add>, %25, %cst_13 [1] : vector<8x8xf32> to vector<8xf32>
    %27 = vector.shape_cast %26 : vector<8xf32> to vector<8x1xf32>
    %28 = tpu.reciprocal %27 {approx = true} : vector<8x1xf32> -> vector<8x1xf32>
    %29 = vector.broadcast %28 : vector<8x1xf32> to vector<8x8xf32>
    %30 = arith.mulf %25, %29 : vector<8x8xf32>
    %31 = vector.extract_strided_slice %13 {offsets = [0, 0], sizes = [8, 8], strides = [1, 1]} : vector<16x32xf32> to vector<8x8xf32>
    %cst_14 = arith.constant dense<0.000000e+00> : vector<8x8xf32>
    %32 = tpu.matmul %30, %31, %cst_14 {dimension_numbers = #tpu.dot_dimension_numbers<[1], [0], [0], [1], [0, 0, 1, 1], [], []>} : vector<8x8xf32>, vector<8x8xf32>, vector<8x8xf32> -> vector<8x8xf32>
    %33 = arith.truncf %32 : vector<8x8xf32> to vector<8x8xbf16>
    %c0_15 = arith.constant 0 : index
    %c0_16 = arith.constant 0 : index
    %34 = vector.load %arg17[%c0_15, %c0_16] : memref<16x32xbf16, #tpu.memory_space<vmem>>, vector<8x8xbf16>
    tpu.vector_store %arg17[%c0_15, %c0_16], %33 {strides = array<i32>} : memref<16x32xbf16, #tpu.memory_space<vmem>>, vector<8x8xbf16>,
    %35 = vector.extract_strided_slice %11 {offsets = [0, 8], sizes = [8, 8], strides = [1, 1]} : vector<16x32xf32> to vector<8x8xf32>
    %36 = vector.extract_strided_slice %12 {offsets = [0, 8], sizes = [8, 8], strides = [1, 1]} : vector<16x32xf32> to vector<8x8xf32>
    %37 = tpu.transpose %36, [1, 0] : vector<8x8xf32> -> vector<8x8xf32>
    %cst_17 = arith.constant dense<0.000000e+00> : vector<8x8xf32>
    %38 = tpu.matmul %35, %37, %cst_17 {dimension_numbers = #tpu.dot_dimension_numbers<[1], [0], [0], [1], [0, 0, 1, 1], [], []>} : vector<8x8xf32>, vector<8x8xf32>, vector<8x8xf32> -> vector<8x8xf32>
    %39 = arith.addf %38, %15 : vector<8x8xf32>
    %cst_18 = arith.constant dense<0xFF800000> : vector<8xf32>
    %40 = vector.multi_reduction <maximumf>, %39, %cst_18 [1] : vector<8x8xf32> to vector<8xf32>
    %41 = vector.shape_cast %40 : vector<8xf32> to vector<8x1xf32>
    %42 = vector.broadcast %41 : vector<8x1xf32> to vector<8x8xf32>
    %43 = arith.subf %39, %42 : vector<8x8xf32>
    %44 = math.exp %43 : vector<8x8xf32>
    %cst_19 = arith.constant dense<0.000000e+00> : vector<8xf32>
    %45 = vector.multi_reduction <add>, %44, %cst_19 [1] : vector<8x8xf32> to vector<8xf32>
    %46 = vector.shape_cast %45 : vector<8xf32> to vector<8x1xf32>
    %47 = tpu.reciprocal %46 {approx = true} : vector<8x1xf32> -> vector<8x1xf32>
    %48 = vector.broadcast %47 : vector<8x1xf32> to vector<8x8xf32>
    %49 = arith.mulf %44, %48 : vector<8x8xf32>
    %50 = vector.extract_strided_slice %13 {offsets = [0, 8], sizes = [8, 8], strides = [1, 1]} : vector<16x32xf32> to vector<8x8xf32>
    %cst_20 = arith.constant dense<0.000000e+00> : vector<8x8xf32>
    %51 = tpu.matmul %49, %50, %cst_20 {dimension_numbers = #tpu.dot_dimension_numbers<[1], [0], [0], [1], [0, 0, 1, 1], [], []>} : vector<8x8xf32>, vector<8x8xf32>, vector<8x8xf32> -> vector<8x8xf32>
    %52 = arith.truncf %51 : vector<8x8xf32> to vector<8x8xbf16>
    %c0_21 = arith.constant 0 : index
    %c8 = arith.constant 8 : index
    %53 = vector.load %arg17[%c0_21, %c8] : memref<16x32xbf16, #tpu.memory_space<vmem>>, vector<8x8xbf16>
    tpu.vector_store %arg17[%c0_21, %c8], %52 {strides = array<i32>} : memref<16x32xbf16, #tpu.memory_space<vmem>>, vector<8x8xbf16>,
    %54 = vector.extract_strided_slice %11 {offsets = [0, 16], sizes = [8, 8], strides = [1, 1]} : vector<16x32xf32> to vector<8x8xf32>
    %55 = vector.extract_strided_slice %12 {offsets = [0, 16], sizes = [8, 8], strides = [1, 1]} : vector<16x32xf32> to vector<8x8xf32>
    %56 = tpu.transpose %55, [1, 0] : vector<8x8xf32> -> vector<8x8xf32>
    %cst_22 = arith.constant dense<0.000000e+00> : vector<8x8xf32>
    %57 = tpu.matmul %54, %56, %cst_22 {dimension_numbers = #tpu.dot_dimension_numbers<[1], [0], [0], [1], [0, 0, 1, 1], [], []>} : vector<8x8xf32>, vector<8x8xf32>, vector<8x8xf32> -> vector<8x8xf32>
    %58 = arith.addf %57, %15 : vector<8x8xf32>
    %cst_23 = arith.constant dense<0xFF800000> : vector<8xf32>
    %59 = vector.multi_reduction <maximumf>, %58, %cst_23 [1] : vector<8x8xf32> to vector<8xf32>
    %60 = vector.shape_cast %59 : vector<8xf32> to vector<8x1xf32>
    %61 = vector.broadcast %60 : vector<8x1xf32> to vector<8x8xf32>
    %62 = arith.subf %58, %61 : vector<8x8xf32>
    %63 = math.exp %62 : vector<8x8xf32>
    %cst_24 = arith.constant dense<0.000000e+00> : vector<8xf32>
    %64 = vector.multi_reduction <add>, %63, %cst_24 [1] : vector<8x8xf32> to vector<8xf32>
    %65 = vector.shape_cast %64 : vector<8xf32> to vector<8x1xf32>
    %66 = tpu.reciprocal %65 {approx = true} : vector<8x1xf32> -> vector<8x1xf32>
    %67 = vector.broadcast %66 : vector<8x1xf32> to vector<8x8xf32>
    %68 = arith.mulf %63, %67 : vector<8x8xf32>
    %69 = vector.extract_strided_slice %13 {offsets = [0, 16], sizes = [8, 8], strides = [1, 1]} : vector<16x32xf32> to vector<8x8xf32>
    %cst_25 = arith.constant dense<0.000000e+00> : vector<8x8xf32>
    %70 = tpu.matmul %68, %69, %cst_25 {dimension_numbers = #tpu.dot_dimension_numbers<[1], [0], [0], [1], [0, 0, 1, 1], [], []>} : vector<8x8xf32>, vector<8x8xf32>, vector<8x8xf32> -> vector<8x8xf32>
    %71 = arith.truncf %70 : vector<8x8xf32> to vector<8x8xbf16>
    %c0_26 = arith.constant 0 : index
    %c16 = arith.constant 16 : index
    %72 = vector.load %arg17[%c0_26, %c16] : memref<16x32xbf16, #tpu.memory_space<vmem>>, vector<8x8xbf16>
    tpu.vector_store %arg17[%c0_26, %c16], %71 {strides = array<i32>} : memref<16x32xbf16, #tpu.memory_space<vmem>>, vector<8x8xbf16>,
    %73 = vector.extract_strided_slice %11 {offsets = [0, 24], sizes = [8, 8], strides = [1, 1]} : vector<16x32xf32> to vector<8x8xf32>
    %74 = vector.extract_strided_slice %12 {offsets = [0, 24], sizes = [8, 8], strides = [1, 1]} : vector<16x32xf32> to vector<8x8xf32>
    %75 = tpu.transpose %74, [1, 0] : vector<8x8xf32> -> vector<8x8xf32>
    %cst_27 = arith.constant dense<0.000000e+00> : vector<8x8xf32>
    %76 = tpu.matmul %73, %75, %cst_27 {dimension_numbers = #tpu.dot_dimension_numbers<[1], [0], [0], [1], [0, 0, 1, 1], [], []>} : vector<8x8xf32>, vector<8x8xf32>, vector<8x8xf32> -> vector<8x8xf32>
    %77 = arith.addf %76, %15 : vector<8x8xf32>
    %cst_28 = arith.constant dense<0xFF800000> : vector<8xf32>
    %78 = vector.multi_reduction <maximumf>, %77, %cst_28 [1] : vector<8x8xf32> to vector<8xf32>
    %79 = vector.shape_cast %78 : vector<8xf32> to vector<8x1xf32>
    %80 = vector.broadcast %79 : vector<8x1xf32> to vector<8x8xf32>
    %81 = arith.subf %77, %80 : vector<8x8xf32>
    %82 = math.exp %81 : vector<8x8xf32>
    %cst_29 = arith.constant dense<0.000000e+00> : vector<8xf32>
    %83 = vector.multi_reduction <add>, %82, %cst_29 [1] : vector<8x8xf32> to vector<8xf32>
    %84 = vector.shape_cast %83 : vector<8xf32> to vector<8x1xf32>
    %85 = tpu.reciprocal %84 {approx = true} : vector<8x1xf32> -> vector<8x1xf32>
    %86 = vector.broadcast %85 : vector<8x1xf32> to vector<8x8xf32>
    %87 = arith.mulf %82, %86 : vector<8x8xf32>
    %88 = vector.extract_strided_slice %13 {offsets = [0, 24], sizes = [8, 8], strides = [1, 1]} : vector<16x32xf32> to vector<8x8xf32>
    %cst_30 = arith.constant dense<0.000000e+00> : vector<8x8xf32>
    %89 = tpu.matmul %87, %88, %cst_30 {dimension_numbers = #tpu.dot_dimension_numbers<[1], [0], [0], [1], [0, 0, 1, 1], [], []>} : vector<8x8xf32>, vector<8x8xf32>, vector<8x8xf32> -> vector<8x8xf32>
    %90 = arith.truncf %89 : vector<8x8xf32> to vector<8x8xbf16>
    %c0_31 = arith.constant 0 : index
    %c24 = arith.constant 24 : index
    %91 = vector.load %arg17[%c0_31, %c24] : memref<16x32xbf16, #tpu.memory_space<vmem>>, vector<8x8xbf16>
    tpu.vector_store %arg17[%c0_31, %c24], %90 {strides = array<i32>} : memref<16x32xbf16, #tpu.memory_space<vmem>>, vector<8x8xbf16>,
    %c1 = arith.constant 1 : index
    %c0_32 = arith.constant 0 : index
    %c0_33 = arith.constant 0 : index
    %92 = vector.load %arg2[%c1, %c0_32, %c0_33] : memref<2x8x8xf32, #tpu.memory_space<vmem>>, vector<1x8x8xf32>
    %93 = vector.shape_cast %92 : vector<1x8x8xf32> to vector<8x8xf32>
    %94 = vector.extract_strided_slice %11 {offsets = [8, 0], sizes = [8, 8], strides = [1, 1]} : vector<16x32xf32> to vector<8x8xf32>
    %95 = vector.extract_strided_slice %12 {offsets = [8, 0], sizes = [8, 8], strides = [1, 1]} : vector<16x32xf32> to vector<8x8xf32>
    %96 = tpu.transpose %95, [1, 0] : vector<8x8xf32> -> vector<8x8xf32>
    %cst_34 = arith.constant dense<0.000000e+00> : vector<8x8xf32>
    %97 = tpu.matmul %94, %96, %cst_34 {dimension_numbers = #tpu.dot_dimension_numbers<[1], [0], [0], [1], [0, 0, 1, 1], [], []>} : vector<8x8xf32>, vector<8x8xf32>, vector<8x8xf32> -> vector<8x8xf32>
    %98 = arith.addf %97, %93 : vector<8x8xf32>
    %cst_35 = arith.constant dense<0xFF800000> : vector<8xf32>
    %99 = vector.multi_reduction <maximumf>, %98, %cst_35 [1] : vector<8x8xf32> to vector<8xf32>
    %100 = vector.shape_cast %99 : vector<8xf32> to vector<8x1xf32>
    %101 = vector.broadcast %100 : vector<8x1xf32> to vector<8x8xf32>
    %102 = arith.subf %98, %101 : vector<8x8xf32>
    %103 = math.exp %102 : vector<8x8xf32>
    %cst_36 = arith.constant dense<0.000000e+00> : vector<8xf32>
    %104 = vector.multi_reduction <add>, %103, %cst_36 [1] : vector<8x8xf32> to vector<8xf32>
    %105 = vector.shape_cast %104 : vector<8xf32> to vector<8x1xf32>
    %106 = tpu.reciprocal %105 {approx = true} : vector<8x1xf32> -> vector<8x1xf32>
    %107 = vector.broadcast %106 : vector<8x1xf32> to vector<8x8xf32>
    %108 = arith.mulf %103, %107 : vector<8x8xf32>
    %109 = vector.extract_strided_slice %13 {offsets = [8, 0], sizes = [8, 8], strides = [1, 1]} : vector<16x32xf32> to vector<8x8xf32>
    %cst_37 = arith.constant dense<0.000000e+00> : vector<8x8xf32>
    %110 = tpu.matmul %108, %109, %cst_37 {dimension_numbers = #tpu.dot_dimension_numbers<[1], [0], [0], [1], [0, 0, 1, 1], [], []>} : vector<8x8xf32>, vector<8x8xf32>, vector<8x8xf32> -> vector<8x8xf32>
    %111 = arith.truncf %110 : vector<8x8xf32> to vector<8x8xbf16>
    %c8_38 = arith.constant 8 : index
    %c0_39 = arith.constant 0 : index
    %112 = vector.load %arg17[%c8_38, %c0_39] : memref<16x32xbf16, #tpu.memory_space<vmem>>, vector<8x8xbf16>
    tpu.vector_store %arg17[%c8_38, %c0_39], %111 {strides = array<i32>} : memref<16x32xbf16, #tpu.memory_space<vmem>>, vector<8x8xbf16>,
    %113 = vector.extract_strided_slice %11 {offsets = [8, 8], sizes = [8, 8], strides = [1, 1]} : vector<16x32xf32> to vector<8x8xf32>
    %114 = vector.extract_strided_slice %12 {offsets = [8, 8], sizes = [8, 8], strides = [1, 1]} : vector<16x32xf32> to vector<8x8xf32>
    %115 = tpu.transpose %114, [1, 0] : vector<8x8xf32> -> vector<8x8xf32>
    %cst_40 = arith.constant dense<0.000000e+00> : vector<8x8xf32>
    %116 = tpu.matmul %113, %115, %cst_40 {dimension_numbers = #tpu.dot_dimension_numbers<[1], [0], [0], [1], [0, 0, 1, 1], [], []>} : vector<8x8xf32>, vector<8x8xf32>, vector<8x8xf32> -> vector<8x8xf32>
    %117 = arith.addf %116, %93 : vector<8x8xf32>
    %cst_41 = arith.constant dense<0xFF800000> : vector<8xf32>
    %118 = vector.multi_reduction <maximumf>, %117, %cst_41 [1] : vector<8x8xf32> to vector<8xf32>
    %119 = vector.shape_cast %118 : vector<8xf32> to vector<8x1xf32>
    %120 = vector.broadcast %119 : vector<8x1xf32> to vector<8x8xf32>
    %121 = arith.subf %117, %120 : vector<8x8xf32>
    %122 = math.exp %121 : vector<8x8xf32>
    %cst_42 = arith.constant dense<0.000000e+00> : vector<8xf32>
    %123 = vector.multi_reduction <add>, %122, %cst_42 [1] : vector<8x8xf32> to vector<8xf32>
    %124 = vector.shape_cast %123 : vector<8xf32> to vector<8x1xf32>
    %125 = tpu.reciprocal %124 {approx = true} : vector<8x1xf32> -> vector<8x1xf32>
    %126 = vector.broadcast %125 : vector<8x1xf32> to vector<8x8xf32>
    %127 = arith.mulf %122, %126 : vector<8x8xf32>
    %128 = vector.extract_strided_slice %13 {offsets = [8, 8], sizes = [8, 8], strides = [1, 1]} : vector<16x32xf32> to vector<8x8xf32>
    %cst_43 = arith.constant dense<0.000000e+00> : vector<8x8xf32>
    %129 = tpu.matmul %127, %128, %cst_43 {dimension_numbers = #tpu.dot_dimension_numbers<[1], [0], [0], [1], [0, 0, 1, 1], [], []>} : vector<8x8xf32>, vector<8x8xf32>, vector<8x8xf32> -> vector<8x8xf32>
    %130 = arith.truncf %129 : vector<8x8xf32> to vector<8x8xbf16>
    %c8_44 = arith.constant 8 : index
    %c8_45 = arith.constant 8 : index
    %131 = vector.load %arg17[%c8_44, %c8_45] : memref<16x32xbf16, #tpu.memory_space<vmem>>, vector<8x8xbf16>
    tpu.vector_store %arg17[%c8_44, %c8_45], %130 {strides = array<i32>} : memref<16x32xbf16, #tpu.memory_space<vmem>>, vector<8x8xbf16>,
    %132 = vector.extract_strided_slice %11 {offsets = [8, 16], sizes = [8, 8], strides = [1, 1]} : vector<16x32xf32> to vector<8x8xf32>
    %133 = vector.extract_strided_slice %12 {offsets = [8, 16], sizes = [8, 8], strides = [1, 1]} : vector<16x32xf32> to vector<8x8xf32>
    %134 = tpu.transpose %133, [1, 0] : vector<8x8xf32> -> vector<8x8xf32>
    %cst_46 = arith.constant dense<0.000000e+00> : vector<8x8xf32>
    %135 = tpu.matmul %132, %134, %cst_46 {dimension_numbers = #tpu.dot_dimension_numbers<[1], [0], [0], [1], [0, 0, 1, 1], [], []>} : vector<8x8xf32>, vector<8x8xf32>, vector<8x8xf32> -> vector<8x8xf32>
    %136 = arith.addf %135, %93 : vector<8x8xf32>
    %cst_47 = arith.constant dense<0xFF800000> : vector<8xf32>
    %137 = vector.multi_reduction <maximumf>, %136, %cst_47 [1] : vector<8x8xf32> to vector<8xf32>
    %138 = vector.shape_cast %137 : vector<8xf32> to vector<8x1xf32>
    %139 = vector.broadcast %138 : vector<8x1xf32> to vector<8x8xf32>
    %140 = arith.subf %136, %139 : vector<8x8xf32>
    %141 = math.exp %140 : vector<8x8xf32>
    %cst_48 = arith.constant dense<0.000000e+00> : vector<8xf32>
    %142 = vector.multi_reduction <add>, %141, %cst_48 [1] : vector<8x8xf32> to vector<8xf32>
    %143 = vector.shape_cast %142 : vector<8xf32> to vector<8x1xf32>
    %144 = tpu.reciprocal %143 {approx = true} : vector<8x1xf32> -> vector<8x1xf32>
    %145 = vector.broadcast %144 : vector<8x1xf32> to vector<8x8xf32>
    %146 = arith.mulf %141, %145 : vector<8x8xf32>
    %147 = vector.extract_strided_slice %13 {offsets = [8, 16], sizes = [8, 8], strides = [1, 1]} : vector<16x32xf32> to vector<8x8xf32>
    %cst_49 = arith.constant dense<0.000000e+00> : vector<8x8xf32>
    %148 = tpu.matmul %146, %147, %cst_49 {dimension_numbers = #tpu.dot_dimension_numbers<[1], [0], [0], [1], [0, 0, 1, 1], [], []>} : vector<8x8xf32>, vector<8x8xf32>, vector<8x8xf32> -> vector<8x8xf32>
    %149 = arith.truncf %148 : vector<8x8xf32> to vector<8x8xbf16>
    %c8_50 = arith.constant 8 : index
    %c16_51 = arith.constant 16 : index
    %150 = vector.load %arg17[%c8_50, %c16_51] : memref<16x32xbf16, #tpu.memory_space<vmem>>, vector<8x8xbf16>
    tpu.vector_store %arg17[%c8_50, %c16_51], %149 {strides = array<i32>} : memref<16x32xbf16, #tpu.memory_space<vmem>>, vector<8x8xbf16>,
    %151 = vector.extract_strided_slice %11 {offsets = [8, 24], sizes = [8, 8], strides = [1, 1]} : vector<16x32xf32> to vector<8x8xf32>
    %152 = vector.extract_strided_slice %12 {offsets = [8, 24], sizes = [8, 8], strides = [1, 1]} : vector<16x32xf32> to vector<8x8xf32>
    %153 = tpu.transpose %152, [1, 0] : vector<8x8xf32> -> vector<8x8xf32>
    %cst_52 = arith.constant dense<0.000000e+00> : vector<8x8xf32>
    %154 = tpu.matmul %151, %153, %cst_52 {dimension_numbers = #tpu.dot_dimension_numbers<[1], [0], [0], [1], [0, 0, 1, 1], [], []>} : vector<8x8xf32>, vector<8x8xf32>, vector<8x8xf32> -> vector<8x8xf32>
    %155 = arith.addf %154, %93 : vector<8x8xf32>
    %cst_53 = arith.constant dense<0xFF800000> : vector<8xf32>
    %156 = vector.multi_reduction <maximumf>, %155, %cst_53 [1] : vector<8x8xf32> to vector<8xf32>
    %157 = vector.shape_cast %156 : vector<8xf32> to vector<8x1xf32>
    %158 = vector.broadcast %157 : vector<8x1xf32> to vector<8x8xf32>
    %159 = arith.subf %155, %158 : vector<8x8xf32>
    %160 = math.exp %159 : vector<8x8xf32>
    %cst_54 = arith.constant dense<0.000000e+00> : vector<8xf32>
    %161 = vector.multi_reduction <add>, %160, %cst_54 [1] : vector<8x8xf32> to vector<8xf32>
    %162 = vector.shape_cast %161 : vector<8xf32> to vector<8x1xf32>
    %163 = tpu.reciprocal %162 {approx = true} : vector<8x1xf32> -> vector<8x1xf32>
    %164 = vector.broadcast %163 : vector<8x1xf32> to vector<8x8xf32>
    %165 = arith.mulf %160, %164 : vector<8x8xf32>
    %166 = vector.extract_strided_slice %13 {offsets = [8, 24], sizes = [8, 8], strides = [1, 1]} : vector<16x32xf32> to vector<8x8xf32>
    %cst_55 = arith.constant dense<0.000000e+00> : vector<8x8xf32>
    %167 = tpu.matmul %165, %166, %cst_55 {dimension_numbers = #tpu.dot_dimension_numbers<[1], [0], [0], [1], [0, 0, 1, 1], [], []>} : vector<8x8xf32>, vector<8x8xf32>, vector<8x8xf32> -> vector<8x8xf32>
    %168 = arith.truncf %167 : vector<8x8xf32> to vector<8x8xbf16>
    %c8_56 = arith.constant 8 : index
    %c24_57 = arith.constant 24 : index
    %169 = vector.load %arg17[%c8_56, %c24_57] : memref<16x32xbf16, #tpu.memory_space<vmem>>, vector<8x8xbf16>
    tpu.vector_store %arg17[%c8_56, %c24_57], %168 {strides = array<i32>} : memref<16x32xbf16, #tpu.memory_space<vmem>>, vector<8x8xbf16>,
    %170 = arith.extf %3 : vector<16x32xbf16> to vector<16x32xf32>
    %c0_58 = arith.constant 0 : index
    %c0_59 = arith.constant 0 : index
    %171 = vector.load %arg17[%c0_58, %c0_59] : memref<16x32xbf16, #tpu.memory_space<vmem>>, vector<16x32xbf16>
    %c0_60 = arith.constant 0 : index
    %c0_61 = arith.constant 0 : index
    %c0_62 = arith.constant 0 : index
    %172 = vector.load %arg5[%c0_60, %c0_61, %c0_62] : memref<1x32x32xbf16, #tpu.memory_space<vmem>>, vector<1x32x32xbf16>
    %173 = vector.shape_cast %172 : vector<1x32x32xbf16> to vector<32x32xbf16>
    %cst_63 = arith.constant dense<0.000000e+00> : vector<16x32xf32>
    %174 = tpu.matmul %171, %173, %cst_63 {dimension_numbers = #tpu.dot_dimension_numbers<[1], [0], [0], [1], [0, 0, 1, 1], [], []>} : vector<16x32xbf16>, vector<32x32xbf16>, vector<16x32xf32> -> vector<16x32xf32>
    %c0_64 = arith.constant 0 : index
    %c0_65 = arith.constant 0 : index
    %c0_66 = arith.constant 0 : index
    %175 = vector.load %arg6[%c0_64, %c0_65, %c0_66] : memref<1x1x32xf32, #tpu.memory_space<vmem>>, vector<1x1x32xf32>
    %176 = vector.shape_cast %175 : vector<1x1x32xf32> to vector<1x32xf32>
    %177 = vector.broadcast %176 : vector<1x32xf32> to vector<16x32xf32>
    %178 = arith.addf %174, %177 : vector<16x32xf32>
    %179 = arith.addf %178, %170 : vector<16x32xf32>
    %c0_67 = arith.constant 0 : index
    %c0_68 = arith.constant 0 : index
    %c0_69 = arith.constant 0 : index
    %180 = vector.load %arg7[%c0_67, %c0_68, %c0_69] : memref<1x1x32xf32, #tpu.memory_space<vmem>>, vector<1x1x32xf32>
    %181 = vector.shape_cast %180 : vector<1x1x32xf32> to vector<1x32xf32>
    %c0_70 = arith.constant 0 : index
    %c0_71 = arith.constant 0 : index
    %c0_72 = arith.constant 0 : index
    %182 = vector.load %arg8[%c0_70, %c0_71, %c0_72] : memref<1x1x32xf32, #tpu.memory_space<vmem>>, vector<1x1x32xf32>
    %183 = vector.shape_cast %182 : vector<1x1x32xf32> to vector<1x32xf32>
    %cst_73 = arith.constant dense<0.000000e+00> : vector<16xf32>
    %184 = vector.multi_reduction <add>, %179, %cst_73 [1] : vector<16x32xf32> to vector<16xf32>
    %185 = vector.shape_cast %184 : vector<16xf32> to vector<16x1xf32>
    %cst_74 = arith.constant 3.200000e+01 : f32
    %186 = vector.broadcast %cst_74 : f32 to vector<16x1xf32>
    %187 = arith.divf %185, %186 : vector<16x1xf32>
    %188 = vector.broadcast %187 : vector<16x1xf32> to vector<16x32xf32>
    %189 = arith.subf %179, %188 : vector<16x32xf32>
    %190 = arith.mulf %189, %189 : vector<16x32xf32>
    %cst_75 = arith.constant dense<0.000000e+00> : vector<16xf32>
    %191 = vector.multi_reduction <add>, %190, %cst_75 [1] : vector<16x32xf32> to vector<16xf32>
    %192 = vector.shape_cast %191 : vector<16xf32> to vector<16x1xf32>
    %cst_76 = arith.constant 3.200000e+01 : f32
    %193 = vector.broadcast %cst_76 : f32 to vector<16x1xf32>
    %194 = arith.divf %192, %193 : vector<16x1xf32>
    %195 = vector.broadcast %187 : vector<16x1xf32> to vector<16x32xf32>
    %196 = arith.subf %179, %195 : vector<16x32xf32>
    %cst_77 = arith.constant 9.99999996E-13 : f32
    %197 = vector.broadcast %cst_77 : f32 to vector<16x1xf32>
    %198 = arith.addf %194, %197 : vector<16x1xf32>
    %199 = math.rsqrt %198 : vector<16x1xf32>
    %200 = vector.broadcast %199 : vector<16x1xf32> to vector<16x32xf32>
    %201 = arith.mulf %196, %200 : vector<16x32xf32>
    %202 = vector.broadcast %181 : vector<1x32xf32> to vector<16x32xf32>
    %203 = arith.mulf %201, %202 : vector<16x32xf32>
    %204 = vector.broadcast %183 : vector<1x32xf32> to vector<16x32xf32>
    %205 = arith.addf %203, %204 : vector<16x32xf32>
    %206 = arith.truncf %205 : vector<16x32xf32> to vector<16x32xbf16>
    %c0_78 = arith.constant 0 : index
    %c0_79 = arith.constant 0 : index
    %c0_80 = arith.constant 0 : index
    %207 = vector.load %arg9[%c0_78, %c0_79, %c0_80] : memref<1x32x64xbf16, #tpu.memory_space<vmem>>, vector<1x32x64xbf16>
    %208 = vector.shape_cast %207 : vector<1x32x64xbf16> to vector<32x64xbf16>
    %cst_81 = arith.constant dense<0.000000e+00> : vector<16x64xf32>
    %209 = tpu.matmul %206, %208, %cst_81 {dimension_numbers = #tpu.dot_dimension_numbers<[1], [0], [0], [1], [0, 0, 1, 1], [], []>} : vector<16x32xbf16>, vector<32x64xbf16>, vector<16x64xf32> -> vector<16x64xf32>
    %c0_82 = arith.constant 0 : index
    %c0_83 = arith.constant 0 : index
    %c0_84 = arith.constant 0 : index
    %210 = vector.load %arg10[%c0_82, %c0_83, %c0_84] : memref<1x1x64xf32, #tpu.memory_space<vmem>>, vector<1x1x64xf32>
    %211 = vector.shape_cast %210 : vector<1x1x64xf32> to vector<1x64xf32>
    %212 = vector.broadcast %211 : vector<1x64xf32> to vector<16x64xf32>
    %213 = arith.addf %209, %212 : vector<16x64xf32>
    %cst_85 = arith.constant 5.000000e-01 : f32
    %214 = vector.broadcast %cst_85 : f32 to vector<16x64xf32>
    %215 = arith.mulf %213, %214 : vector<16x64xf32>
    %cst_86 = arith.constant 1.41421354 : f32
    %216 = vector.broadcast %cst_86 : f32 to vector<16x64xf32>
    %217 = arith.divf %213, %216 : vector<16x64xf32>
    %218 = math.erf %217 : vector<16x64xf32>
    %cst_87 = arith.constant 1.000000e+00 : f32
    %219 = vector.broadcast %cst_87 : f32 to vector<16x64xf32>
    %220 = arith.addf %219, %218 : vector<16x64xf32>
    %221 = arith.mulf %215, %220 : vector<16x64xf32>
    %222 = arith.truncf %221 : vector<16x64xf32> to vector<16x64xbf16>
    %c0_88 = arith.constant 0 : index
    %c0_89 = arith.constant 0 : index
    %c0_90 = arith.constant 0 : index
    %223 = vector.load %arg11[%c0_88, %c0_89, %c0_90] : memref<1x64x32xbf16, #tpu.memory_space<vmem>>, vector<1x64x32xbf16>
    %224 = vector.shape_cast %223 : vector<1x64x32xbf16> to vector<64x32xbf16>
    %cst_91 = arith.constant dense<0.000000e+00> : vector<16x32xf32>
    %225 = tpu.matmul %222, %224, %cst_91 {dimension_numbers = #tpu.dot_dimension_numbers<[1], [0], [0], [1], [0, 0, 1, 1], [], []>} : vector<16x64xbf16>, vector<64x32xbf16>, vector<16x32xf32> -> vector<16x32xf32>
    %c0_92 = arith.constant 0 : index
    %c0_93 = arith.constant 0 : index
    %c0_94 = arith.constant 0 : index
    %226 = vector.load %arg12[%c0_92, %c0_93, %c0_94] : memref<1x1x32xf32, #tpu.memory_space<vmem>>, vector<1x1x32xf32>
    %227 = vector.shape_cast %226 : vector<1x1x32xf32> to vector<1x32xf32>
    %228 = vector.broadcast %227 : vector<1x32xf32> to vector<16x32xf32>
    %229 = arith.addf %225, %228 : vector<16x32xf32>
    %230 = arith.addf %229, %205 : vector<16x32xf32>
    %c0_95 = arith.constant 0 : index
    %c0_96 = arith.constant 0 : index
    %c0_97 = arith.constant 0 : index
    %231 = vector.load %arg13[%c0_95, %c0_96, %c0_97] : memref<1x1x32xf32, #tpu.memory_space<vmem>>, vector<1x1x32xf32>
    %232 = vector.shape_cast %231 : vector<1x1x32xf32> to vector<1x32xf32>
    %c0_98 = arith.constant 0 : index
    %c0_99 = arith.constant 0 : index
    %c0_100 = arith.constant 0 : index
    %233 = vector.load %arg14[%c0_98, %c0_99, %c0_100] : memref<1x1x32xf32, #tpu.memory_space<vmem>>, vector<1x1x32xf32>
    %234 = vector.shape_cast %233 : vector<1x1x32xf32> to vector<1x32xf32>
    %cst_101 = arith.constant dense<0.000000e+00> : vector<16xf32>
    %235 = vector.multi_reduction <add>, %230, %cst_101 [1] : vector<16x32xf32> to vector<16xf32>
    %236 = vector.shape_cast %235 : vector<16xf32> to vector<16x1xf32>
    %cst_102 = arith.constant 3.200000e+01 : f32
    %237 = vector.broadcast %cst_102 : f32 to vector<16x1xf32>
    %238 = arith.divf %236, %237 : vector<16x1xf32>
    %239 = vector.broadcast %238 : vector<16x1xf32> to vector<16x32xf32>
    %240 = arith.subf %230, %239 : vector<16x32xf32>
    %241 = arith.mulf %240, %240 : vector<16x32xf32>
    %cst_103 = arith.constant dense<0.000000e+00> : vector<16xf32>
    %242 = vector.multi_reduction <add>, %241, %cst_103 [1] : vector<16x32xf32> to vector<16xf32>
    %243 = vector.shape_cast %242 : vector<16xf32> to vector<16x1xf32>
    %cst_104 = arith.constant 3.200000e+01 : f32
    %244 = vector.broadcast %cst_104 : f32 to vector<16x1xf32>
    %245 = arith.divf %243, %244 : vector<16x1xf32>
    %246 = vector.broadcast %238 : vector<16x1xf32> to vector<16x32xf32>
    %247 = arith.subf %230, %246 : vector<16x32xf32>
    %cst_105 = arith.constant 9.99999996E-13 : f32
    %248 = vector.broadcast %cst_105 : f32 to vector<16x1xf32>
    %249 = arith.addf %245, %248 : vector<16x1xf32>
    %250 = math.rsqrt %249 : vector<16x1xf32>
    %251 = vector.broadcast %250 : vector<16x1xf32> to vector<16x32xf32>
    %252 = arith.mulf %247, %251 : vector<16x32xf32>
    %253 = vector.broadcast %232 : vector<1x32xf32> to vector<16x32xf32>
    %254 = arith.mulf %252, %253 : vector<16x32xf32>
    %255 = vector.broadcast %234 : vector<1x32xf32> to vector<16x32xf32>
    %256 = arith.addf %254, %255 : vector<16x32xf32>
    %257 = arith.truncf %256 : vector<16x32xf32> to vector<16x32xbf16>
    %c0_106 = arith.constant 0 : index
    %c0_107 = arith.constant 0 : index
    %258 = vector.load %arg16[%c0_106, %c0_107] : memref<16x32xbf16, #tpu.memory_space<vmem>>, vector<16x32xbf16>
    tpu.vector_store %arg16[%c0_106, %c0_107], %257 {strides = array<i32>} : memref<16x32xbf16, #tpu.memory_space<vmem>>, vector<16x32xbf16>,
    %c1_i32 = arith.constant 1 : i32
    %259 = arith.cmpi eq, %arg0, %c1_i32 : i32
    %260 = arith.extui %259 : i1 to i32
    %c0_i32_108 = arith.constant 0 : i32
    %261 = arith.cmpi ne, %260, %c0_i32_108 : i32
    scf.if %261 {
      %c0_109 = arith.constant 0 : index
      %c0_110 = arith.constant 0 : index
      %262 = vector.load %arg16[%c0_109, %c0_110] : memref<16x32xbf16, #tpu.memory_space<vmem>>, vector<8x32xbf16>
      %c0_111 = arith.constant 0 : index
      %c0_112 = arith.constant 0 : index
      %c0_113 = arith.constant 0 : index
      %263 = vector.load %arg15[%c0_111, %c0_112, %c0_113] : memref<2x8x32xbf16, #tpu.memory_space<vmem>>, vector<1x8x32xbf16>
      %264 = vector.shape_cast %263 : vector<1x8x32xbf16> to vector<8x32xbf16>
      %265 = vector.shape_cast %262 : vector<8x32xbf16> to vector<1x8x32xbf16>
      tpu.vector_store %arg15[%c0_111, %c0_112, %c0_113], %265 {strides = array<i32>} : memref<2x8x32xbf16, #tpu.memory_space<vmem>>, vector<1x8x32xbf16>,
      %c8_114 = arith.constant 8 : index
      %c0_115 = arith.constant 0 : index
      %266 = vector.load %arg16[%c8_114, %c0_115] : memref<16x32xbf16, #tpu.memory_space<vmem>>, vector<8x32xbf16>
      %c1_116 = arith.constant 1 : index
      %c0_117 = arith.constant 0 : index
      %c0_118 = arith.constant 0 : index
      %267 = vector.load %arg15[%c1_116, %c0_117, %c0_118] : memref<2x8x32xbf16, #tpu.memory_space<vmem>>, vector<1x8x32xbf16>
      %268 = vector.shape_cast %267 : vector<1x8x32xbf16> to vector<8x32xbf16>
      %269 = vector.shape_cast %266 : vector<8x32xbf16> to vector<1x8x32xbf16>
      tpu.vector_store %arg15[%c1_116, %c0_117, %c0_118], %269 {strides = array<i32>} : memref<2x8x32xbf16, #tpu.memory_space<vmem>>, vector<1x8x32xbf16>,
    } else {
    }
    return
  }
  func.func @transform_0(%arg0: i32) -> (i32, i32, i32) {
    %c0_i32 = arith.constant 0 : i32
    %c0_i32_0 = arith.constant 0 : i32
    %c0_i32_1 = arith.constant 0 : i32
    %c0_i32_2 = arith.constant 0 : i32
    return %c0_i32, %c0_i32_0, %c0_i32_1 : i32, i32, i32
  }
  func.func @transform_1(%arg0: i32) -> (i32, i32, i32) {
    %c0_i32 = arith.constant 0 : i32
    %c0_i32_0 = arith.constant 0 : i32
    %c0_i32_1 = arith.constant 0 : i32
    %c0_i32_2 = arith.constant 0 : i32
    return %c0_i32, %c0_i32_0, %c0_i32_1 : i32, i32, i32
  }
  func.func @transform_2(%arg0: i32) -> (i32, i32, i32) {
    %c0_i32 = arith.constant 0 : i32
    %c0_i32_0 = arith.constant 0 : i32
    %c0_i32_1 = arith.constant 0 : i32
    return %arg0, %c0_i32, %c0_i32_0 : i32, i32, i32
  }
  func.func @transform_3(%arg0: i32) -> (i32, i32, i32) {
    %c0_i32 = arith.constant 0 : i32
    %c0_i32_0 = arith.constant 0 : i32
    %c0_i32_1 = arith.constant 0 : i32
    return %arg0, %c0_i32, %c0_i32_0 : i32, i32, i32
  }
  func.func @transform_4(%arg0: i32) -> (i32, i32, i32) {
    %c0_i32 = arith.constant 0 : i32
    %c0_i32_0 = arith.constant 0 : i32
    %c0_i32_1 = arith.constant 0 : i32
    return %arg0, %c0_i32, %c0_i32_0 : i32, i32, i32
  }
  func.func @transform_5(%arg0: i32) -> (i32, i32, i32) {
    %c0_i32 = arith.constant 0 : i32
    %c0_i32_0 = arith.constant 0 : i32
    %c0_i32_1 = arith.constant 0 : i32
    return %arg0, %c0_i32, %c0_i32_0 : i32, i32, i32
  }
  func.func @transform_6(%arg0: i32) -> (i32, i32, i32) {
    %c0_i32 = arith.constant 0 : i32
    %c0_i32_0 = arith.constant 0 : i32
    %c0_i32_1 = arith.constant 0 : i32
    return %arg0, %c0_i32, %c0_i32_0 : i32, i32, i32
  }
  func.func @transform_7(%arg0: i32) -> (i32, i32, i32) {
    %c0_i32 = arith.constant 0 : i32
    %c0_i32_0 = arith.constant 0 : i32
    %c0_i32_1 = arith.constant 0 : i32
    return %arg0, %c0_i32, %c0_i32_0 : i32, i32, i32
  }
  func.func @transform_8(%arg0: i32) -> (i32, i32, i32) {
    %c0_i32 = arith.constant 0 : i32
    %c0_i32_0 = arith.constant 0 : i32
    %c0_i32_1 = arith.constant 0 : i32
    return %arg0, %c0_i32, %c0_i32_0 : i32, i32, i32
  }
  func.func @transform_9(%arg0: i32) -> (i32, i32, i32) {
    %c0_i32 = arith.constant 0 : i32
    %c0_i32_0 = arith.constant 0 : i32
    %c0_i32_1 = arith.constant 0 : i32
    return %arg0, %c0_i32, %c0_i32_0 : i32, i32, i32
  }
  func.func @transform_10(%arg0: i32) -> (i32, i32, i32) {
    %c0_i32 = arith.constant 0 : i32
    %c0_i32_0 = arith.constant 0 : i32
    %c0_i32_1 = arith.constant 0 : i32
    return %arg0, %c0_i32, %c0_i32_0 : i32, i32, i32
  }
  func.func @transform_11(%arg0: i32) -> (i32, i32, i32) {
    %c0_i32 = arith.constant 0 : i32
    %c0_i32_0 = arith.constant 0 : i32
    %c0_i32_1 = arith.constant 0 : i32
    return %arg0, %c0_i32, %c0_i32_0 : i32, i32, i32
  }
  func.func @transform_12(%arg0: i32) -> (i32, i32, i32) {
    %c0_i32 = arith.constant 0 : i32
    %c0_i32_0 = arith.constant 0 : i32
    %c0_i32_1 = arith.constant 0 : i32
    return %arg0, %c0_i32, %c0_i32_0 : i32, i32, i32
  }
  func.func @transform_13(%arg0: i32) -> (i32, i32, i32) {
    %c0_i32 = arith.constant 0 : i32
    %c0_i32_0 = arith.constant 0 : i32
    %c0_i32_1 = arith.constant 0 : i32
    return %arg0, %c0_i32, %c0_i32_0 : i32, i32, i32
  }
  func.func @transform_14(%arg0: i32) -> (i32, i32, i32) {
    %c0_i32 = arith.constant 0 : i32
    %c0_i32_0 = arith.constant 0 : i32
    %c0_i32_1 = arith.constant 0 : i32
    %c0_i32_2 = arith.constant 0 : i32
    return %c0_i32, %c0_i32_0, %c0_i32_1 : i32, i32, i32
  }
}

</mosaic_0001>

<bundles_post_ra>
// kernel: tpu_custom_call.1
= control target key start
LH: loop header
LB: loop body
LE: loop exit
PB: predicated region body
PF: predicated region fallthrough
CT: control target
= control target key end

     0   :  { %s3950_s0 = inlined_call_operand.hbm [shape: bf16[2,8,32], index: 0, kind: input, shape index: {}]   ;;  %s3951_s1 = inlined_call_operand.hbm [shape: f32[2,8,8], index: 1, kind: input, shape index: {}]   ;;  %s3952_s2 = inlined_call_operand.vmem [shape: bf16[2,32,96], index: 2, kind: input, shape index: {}]   ;;  %s3953_s3 = inlined_call_operand.vmem [shape: f32[2,1,96], index: 3, kind: input, shape index: {}]   ;;  %s3954_s4 = inlined_call_operand.vmem [shape: bf16[2,32,32], index: 4, kind: input, shape index: {}]   ;;  %s3955_s5 = inlined_call_operand.vmem [shape: f32[2,1,32], index: 5, kind: input, shape index: {}]   ;;  %s3956_s6 = inlined_call_operand.hbm [shape: f32[2,1,32], index: 6, kind: input, shape index: {}]   ;;  %s3957_s7 = inlined_call_operand.hbm [shape: f32[2,1,32], index: 7, kind: input, shape index: {}]   ;;  %s3958_s8 = inlined_call_operand.vmem [shape: bf16[2,32,64], index: 8, kind: input, shape index: {}]   ;;  %s3959_s9 = inlined_call_operand.hbm [shape: f32[2,1,64], index: 9, kind: input, shape index: {}]   ;;  %s3960_s10 = inlined_call_operand.vmem [shape: bf16[2,64,32], index: 10, kind: input, shape index: {}]   ;;  %s3961_s11 = inlined_call_operand.vmem [shape: f32[2,1,32], index: 11, kind: input, shape index: {}]   ;;  %s3962_s12 = inlined_call_operand.vmem [shape: f32[2,1,32], index: 12, kind: input, shape index: {}]   ;;  %s3963_s13 = inlined_call_operand.vmem [shape: f32[2,1,32], index: 13, kind: input, shape index: {}]   ;;  %s3964_s14 = inlined_call_operand.hbm [shape: bf16[2,8,32], index: 14, kind: output, shape index: {}]  }
   0x1   :  { %3979 = sst [smem:[#allocation20_spill]] %s3950_s0 }
   0x2   :  { %3980 = sst [smem:[#allocation21_spill]] %s3951_s1 }
   0x3   :  { %3981 = sst [smem:[#allocation22_spill]] %s3952_s2 }
   0x4   :  { %3982 = sst [smem:[#allocation23_spill]] %s3954_s4 }
   0x5   :  { %3983 = sst [smem:[#allocation24_spill]] %s3956_s6 }
   0x6   :  { %3984 = sst [smem:[#allocation25_spill]] %s3960_s10 }
   0x7   :  { %3985 = sst [smem:[#allocation26_spill]] %s3962_s12 }
   0x8   :  { %3986 = sst [smem:[#allocation27_spill]] %s3963_s13 }
   0x9   :  { %3987 = sst [smem:[#allocation28_spill]] %s3964_s14 }
   0xa   :  { %19 = vsyncpa [#allocation5], 0 }
   0xb   :  { %20 = vsyncpa [#allocation8], 0 }
   0xc   :  { %21 = vsyncpa [#allocation6], 0  ;;  %s3428_s29 = smov 0   ;;  %s3430_s30 = smov 0  }
   0xd   :  { %s3432_s15 = smov 0   ;;  %s3434_s16 = smov 0  }
   0xe LB: > { %3988 = sst [smem:[#allocation17_spill]] %s3320_s15  ;;  %s3447_s17 = sadd.s32 4294967295, %s3324_s16   ;;  %s3324_s16 = sphi %s3434_s16, %s4024_s16   ;;  %s3320_s15 = sphi %s3432_s15, %s4026_s15   ;;  %s3316_s30 = sphi %s3430_s30, %s4028_s30   ;;  %s3312_s29 = sphi %s3428_s29, %s4027_s29  }
   0xf   : > { %p193_p0 = scmp.ne.s32.totalorder %s3316_s30, %s3312_s29  ;;  %p3968_p1 = scmp.eq.s32.totalorder %s3447_s17, 0 }
  0x10   : > { %p2714_p2 = scmp.ge.s32.totalorder %s3324_s16, 1  ;;  %p407_p3 = scmp.lt.s32.totalorder %s3324_s16, 3 }
  0x11   : > { %p3456_p5 = por %p3968_p1, %p193_p0  ;;  %s3326_s20 = smov [#allocation4]  }
  0x12   : > { %p3460_p6 = pnand %p2714_p2, %p407_p3  ;;  %s419_s21 = sshll.u32 %s3326_s20, 4  ;;  %s420_s21 = int_to_ptr.vmem [resolvable:$true] %s419_s21 }
  0x13   : > { %s3989_s18 = scalar_select %p3456_p5, 1, 0 }
  0x14   : > { %s3990_s19 = scalar_select %p3460_p6, 1, 0 }
  0x15   : > { %p2970_p7 = pneg %p3460_p6  ;;  %s3473_s23 = sadd.s32 1, %s3324_s16  }
  0x16   : > { %3992 = sst [smem:[#allocation18_spill]] %s3473_s23  ;;  %s180_s24 = sadd.s32 1, %s3320_s15 }
  0x17   : > { %p3468_p8 = pnand %p2970_p7, %p3968_p1  ;;  %s177_s25 = ssub.s32 %s3324_s16, %s3473_s23 }
  0x18   : > { %s3993_s0 = sld [smem:[#allocation20_spill]] }
  0x19   : > { %s3991_s22 = scalar_select %p3468_p8, 1, 0 }
  0x1a   : > { %p3972_p10 = pneg %p3468_p8 }
  0x1e   : > { %s3106_s28 = scalar_lea.hbm %s3993_s0, 128 }
  0x1f   : > { %p3107_p9 = scmp.ne.s32.totalorder %s3993_s0, %s3106_s28  ;;  %p3113_p13 = scmp.lt.u32.totalorder %s3106_s28, %s3993_s0 }
  0x21   : > { %p3109_p11 = pnand %p3972_p10, %p3107_p9 }
  0x23   : > { %p3110_p12 = pneg %p3109_p11 }
  0x25   : > { %p3115_p0 = pnand %p3113_p13, %p3110_p12 }
  0x27   : > { %3118 = shalt.err (!%p3115_p0)
}
  0x28   : > { %s3119_s23 = scalar_lea.vmem %s420_s21, 128  ;;  %p3127_p4 = scmp.lt.s32.totalorder %s420_s21, %s420_s21 }
  0x29   : > { %p3120_p2 = scmp.ne.s32.totalorder %s420_s21, %s3119_s23  ;;  %p3128_p1 = scmp.lt.s32.totalorder %s3119_s23, %s3119_s23 }
  0x2b   : > { %p3122_p3 = pnand %p3120_p2, %p3972_p10  ;;  %p3129_p5 = por %p3128_p1, %p3127_p4 }
  0x2d   : > { %p3123_p7 = pneg %p3122_p3 }
  0x2f   : > { %p3130_p6 = pnand %p3129_p5, %p3123_p7 }
  0x31   : > { %3133 = shalt.err (!%p3130_p6)
}
  0x32   : > { %s3327_s26 = smov 64   ;;  %s3328_s13 = smov 4  }
  0x33   : > { %2973 = dma.hbm_to_vmem [thread:$0]  (!%p3468_p8), %s3993_s0, 128, %s420_s21, [#allocation5], %s3327_s26, %s3327_s26, %s3328_s13  }
  0x34   : > { %p178_p9 = scmp.eq.s32.totalorder %s177_s25, 0  ;;  %p187_p1 = scmp.ne.s32.totalorder %s3320_s15, %s3316_s30 }
  0x35   : > { %p188_p4 = scmp.eq.s32.totalorder %s3324_s16, 0  ;;  %p2989_p5 = scmp.lt.s32.totalorder %s3324_s16, 2 }
  0x36   : > { %s3505_s23 = scalar_select %p178_p9, %s3320_s15, %s180_s24  }
  0x37   : > { %p189_p6 = por %p188_p4, %p187_p1  ;;  %s474_s28 = sand.u32 1, %s3324_s16  }
  0x38   : > { %3994 = sst [smem:[#allocation19_spill]] %s3505_s23  ;;  %s3509_s29 = sand.u32 1, %s3320_s15  }
  0x39   : > { %s3512_s20 = sshll.u32 %s3324_s16, 4  ;;  %s3995_s6 = sld [smem:[#allocation24_spill]] }
  0x3a   : > { %s477_s24 = scalar_lea.vmem [#allocation9], %s3509_s29  ;;  %p3523_p11 = pnand %p2989_p5, %p189_p6 }
  0x3b   : > { %s484_s25 = sshll.u32 %s477_s24, 4  ;;  %s3531_s10 = scalar_lea.hbm %s3957_s7, %s3512_s20  ;;  %s3521_s25 = int_to_ptr.vmem [resolvable:$true] %s484_s25 }
  0x3c   : > { %s3996_s26 = scalar_select %p3523_p11, 1, 0 }
  0x3d   : > { %s494_s12 = scalar_lea.vmem [#allocation10], %s3509_s29  ;;  %s3536_s27 = scalar_lea.sflag [#allocation5], %s474_s28 }
  0x3e   : > { %s3534_s14 = sshll.u32 %s494_s12, 4  ;;  %p3542_p13 = pneg %p3523_p11  ;;  %s502_s14 = int_to_ptr.vmem [resolvable:$true] %s3534_s14 }
  0x3f   : > { %s3518_s21 = scalar_lea.hbm %s3995_s6, %s3512_s20  ;;  %s3139_s23 = scalar_lea.hbm %s3995_s6, 32 }
  0x40   : > { %s3134_s0 = scalar_lea.hbm %s3518_s21, 16  ;;  %p3140_p3 = scmp.lt.u32.totalorder %s3518_s21, %s3995_s6 }
  0x41   : > { %p3135_p12 = scmp.ne.s32.totalorder %s3518_s21, %s3134_s0  ;;  %p3141_p7 = scmp.lt.u32.totalorder %s3139_s23, %s3134_s0 }
  0x42   : > { %s3997_s24 = scalar_select %p3542_p13, 1, 0 }
  0x43   : > { %p3137_p0 = pnand %p3542_p13, %p3135_p12  ;;  %p3142_p9 = por %p3141_p7, %p3140_p3 }
  0x44   : > { %p3143_p1 = scmp.lt.u32.totalorder %s3134_s0, %s3518_s21 }
  0x45   : > { %p3138_p2 = pneg %p3137_p0 }
  0x46   : > { %p3144_p4 = por %p3143_p1, %p3142_p9 }
  0x48   : > { %p3145_p5 = pnand %p3144_p4, %p3138_p2 }
  0x4a   : > { %3148 = shalt.err (!%p3145_p5)
}
  0x4b   : > { %s3149_s28 = scalar_lea.vmem %s3521_s25, 16  ;;  %s3329_s16 = smov [#allocation9]  }
  0x4c   : > { %p3150_p6 = scmp.ne.s32.totalorder %s3521_s25, %s3149_s28  ;;  %s3154_s13 = sshll.u32 %s3329_s16, 4  ;;  %s3155_s13 = int_to_ptr.vmem [resolvable:$false] %s3154_s13 }
  0x4d   : > { %s3156_s15 = scalar_lea.vmem %s3155_s13, 32  ;;  %p3157_p10 = scmp.lt.s32.totalorder %s3521_s25, %s3155_s13 }
  0x4e   : > { %p3152_p12 = pnand %p3150_p6, %p3542_p13  ;;  %p3158_p8 = scmp.lt.s32.totalorder %s3156_s15, %s3149_s28 }
  0x50   : > { %p3153_p0 = pneg %p3152_p12  ;;  %p3159_p3 = por %p3158_p8, %p3157_p10 }
  0x52   : > { %p3160_p7 = pnand %p3159_p3, %p3153_p0 }
  0x54   : > { %3163 = shalt.err (!%p3160_p7)
}
  0x55   : > { %2980 = dma.hbm_to_vmem [thread:$0]  (!%p3523_p11), %s3518_s21, 16, %s3521_s25, %s3536_s27  }
  0x56   : > { %s3164_s0 = scalar_lea.hbm %s3531_s10, 16  ;;  %s3169_s28 = scalar_lea.hbm %s3957_s7, 32 }
  0x57   : > { %p3165_p2 = scmp.ne.s32.totalorder %s3531_s10, %s3164_s0  ;;  %p3170_p10 = scmp.lt.u32.totalorder %s3531_s10, %s3957_s7 }
  0x58   : > { %p3171_p1 = scmp.lt.u32.totalorder %s3169_s28, %s3164_s0  ;;  %p3173_p5 = scmp.lt.u32.totalorder %s3164_s0, %s3531_s10 }
  0x59   : > { %p3167_p9 = pnand %p3165_p2, %p3542_p13 }
  0x5a   : > { %p3172_p4 = por %p3171_p1, %p3170_p10 }
  0x5b   : > { %p3168_p8 = pneg %p3167_p9 }
  0x5c   : > { %p3174_p6 = por %p3173_p5, %p3172_p4 }
  0x5e   : > { %p3175_p12 = pnand %p3174_p6, %p3168_p8 }
  0x60   : > { %3178 = shalt.err (!%p3175_p12)
}
  0x61   : > { %s3179_s21 = scalar_lea.vmem %s502_s14, 16  ;;  %s3330_s25 = smov [#allocation10]  }
  0x62   : > { %p3180_p0 = scmp.ne.s32.totalorder %s502_s14, %s3179_s21  ;;  %s3184_s15 = sshll.u32 %s3330_s25, 4  ;;  %s3185_s15 = int_to_ptr.vmem [resolvable:$false] %s3184_s15 }
  0x63   : > { %s3186_s23 = scalar_lea.vmem %s3185_s15, 32  ;;  %p3187_p2 = scmp.lt.s32.totalorder %s502_s14, %s3185_s15 }
  0x64   : > { %p3182_p3 = pnand %p3180_p0, %p3542_p13  ;;  %p3188_p9 = scmp.lt.s32.totalorder %s3186_s23, %s3179_s21 }
  0x66   : > { %p3183_p7 = pneg %p3182_p3  ;;  %p3189_p11 = por %p3188_p9, %p3187_p2 }
  0x68   : > { %p3190_p1 = pnand %p3189_p11, %p3183_p7 }
  0x6a   : > { %3193 = shalt.err (!%p3190_p1)
}
  0x6b   : > { %p3998_p10 = scmp.ne.s32.totalorder %s3996_s26, 0  ;;  %s3331_s0 = smov [#allocation7]  }
  0x6c   : > { %s432_s12 = sshll.u32 %s3331_s0, 4  ;;  %s3999_s1 = sld [smem:[#allocation21_spill]]  ;;  %s433_s12 = int_to_ptr.vmem [resolvable:$true] %s432_s12 }
  0x6d   : > { %2983 = dma.hbm_to_vmem [thread:$0]  (!%p3998_p10), %s3531_s10, 16, %s502_s14, %s3536_s27  }
  0x6e   : > { %p4000_p4 = scmp.ne.s32.totalorder %s3991_s22, 0 }
  0x70   : > { %p4001_p11 = pneg %p4000_p4 }
  0x72   : > { %s3194_s13 = scalar_lea.hbm %s3999_s1, 256 }
  0x73   : > { %p3195_p8 = scmp.ne.s32.totalorder %s3999_s1, %s3194_s13  ;;  %p3201_p12 = scmp.lt.u32.totalorder %s3194_s13, %s3999_s1 }
  0x75   : > { %p3197_p5 = pnand %p3195_p8, %p4001_p11 }
  0x77   : > { %p3198_p6 = pneg %p3197_p5 }
  0x79   : > { %p3203_p0 = pnand %p3201_p12, %p3198_p6 }
  0x7b   : > { %3206 = shalt.err (!%p3203_p0)
}
  0x7c   : > { %s3207_s10 = scalar_lea.vmem %s433_s12, 256  ;;  %p4002_p7 = pmov %p4001_p11 }
  0x7d   : > { %p3208_p3 = scmp.ne.s32.totalorder %s433_s12, %s3207_s10  ;;  %p3215_p1 = scmp.lt.s32.totalorder %s433_s12, %s433_s12 }
  0x7e   : > { %p3216_p10 = scmp.lt.s32.totalorder %s3207_s10, %s3207_s10 }
  0x7f   : > { %p3210_p2 = pnand %p3208_p3, %p4002_p7 }
  0x80   : > { %p3217_p13 = por %p3216_p10, %p3215_p1 }
  0x81   : > { %p3211_p9 = pneg %p3210_p2 }
  0x83   : > { %p3218_p8 = pnand %p3217_p13, %p3211_p9 }
  0x85   : > { %3221 = shalt.err (!%p3218_p8)
}
  0x86   : > { %s3332_s6 = smov 128   ;;  %s3333_s14 = smov 8  }
  0x87   : > { %2976 = dma.hbm_to_vmem [thread:$0]  (!%p4000_p4), %s3999_s1, 256, %s433_s12, [#allocation8], %s3332_s6, %s3332_s6, %s3333_s14  }
  0x88   : > { %s3609_s13 = scalar_lea.hbm %s3959_s9, %s3512_s20  ;;  %s519_s25 = scalar_lea.vmem [#allocation11], %s3509_s29 }
  0x89   : > { %s526_s21 = sshll.u32 %s519_s25, 4  ;;  %s3222_s15 = scalar_lea.hbm %s3609_s13, 16  ;;  %s527_s21 = int_to_ptr.vmem [resolvable:$true] %s526_s21 }
  0x8a   : > { %p3223_p13 = scmp.ne.s32.totalorder %s3609_s13, %s3222_s15  ;;  %p4003_p10 = scmp.ne.s32.totalorder %s3997_s24, 0 }
  0x8b   : > { %s3227_s12 = scalar_lea.hbm %s3959_s9, 32  ;;  %p3228_p4 = scmp.lt.u32.totalorder %s3609_s13, %s3959_s9 }
  0x8c   : > { %p3225_p11 = pnand %p3223_p13, %p4003_p10  ;;  %p3229_p6 = scmp.lt.u32.totalorder %s3227_s12, %s3222_s15 }
  0x8d   : > { %p3231_p0 = scmp.lt.u32.totalorder %s3222_s15, %s3609_s13 }
  0x8e   : > { %p3226_p5 = pneg %p3225_p11  ;;  %p3230_p12 = por %p3229_p6, %p3228_p4 }
  0x90   : > { %p3232_p3 = por %p3231_p0, %p3230_p12 }
  0x92   : > { %p3233_p7 = pnand %p3232_p3, %p3226_p5 }
  0x94   : > { %3236 = shalt.err (!%p3233_p7)
}
  0x95   : > { %s3237_s29 = scalar_lea.vmem %s527_s21, 16  ;;  %s3334_s20 = smov [#allocation11]  }
  0x96   : > { %p3238_p2 = scmp.ne.s32.totalorder %s527_s21, %s3237_s29  ;;  %s3242_s23 = sshll.u32 %s3334_s20, 4  ;;  %s3243_s23 = int_to_ptr.vmem [resolvable:$false] %s3242_s23 }
  0x97   : > { %s3244_s0 = scalar_lea.vmem %s3243_s23, 32  ;;  %p3245_p8 = scmp.lt.s32.totalorder %s527_s21, %s3243_s23 }
  0x98   : > { %p3240_p9 = pnand %p3238_p2, %p4003_p10  ;;  %p3246_p13 = scmp.lt.s32.totalorder %s3244_s0, %s3237_s29 }
  0x9a   : > { %p3241_p1 = pneg %p3240_p9  ;;  %p3247_p11 = por %p3246_p13, %p3245_p8 }
  0x9c   : > { %p3248_p4 = pnand %p3247_p11, %p3241_p1 }
  0x9e   : > { %3251 = shalt.err (!%p3248_p4)
}
  0x9f   : > { %p4004_p6 = scmp.ne.s32.totalorder %s3996_s26, 0  ;;  %p4005_p5 = scmp.ne.s32.totalorder %s3990_s19, 0 }
  0xa0   : > { %p4006_p10 = scmp.eq.s32.totalorder (!%p4005_p5), %s3447_s17, 0 }
  0xa1   : > { %2986 = dma.hbm_to_vmem [thread:$0]  (!%p4004_p6), %s3609_s13, 16, %s527_s21, %s3536_s27  }
  0xa2   : > { %561 = sbr.rel (%p4005_p5) target bundleno = 3346 (0xd12), region = 76 }
  0xa9   : > { %3295 = dma.done.wait (%p4006_p10), [#allocation5], 128   ;;  %p4007_p12 = pmov %p4006_p10 }
  0xaa   : > { %p4008_p0 = pmov %p4006_p10 }
  0xab   : > { %3297 = vsyncadd (%p4007_p12), [#allocation5], 4294967168 }
  0xac   : > { %3299 = dma.done.wait (%p4008_p0), [#allocation8], 256   ;;  %p4009_p3 = pmov %p4008_p0 }
  0xad   : > { %s571_s26 = sand.u32 1, %s3447_s17   ;;  %s3642_s27 = sand.u32 1, %s3316_s30  }
  0xae   : > { %3301 = vsyncadd (%p4009_p3), [#allocation8], 4294967040  ;;  %s572_s19 = scalar_lea.sflag [#allocation5], %s571_s26  ;;  %p4010_p7 = scmp.ne.s32.totalorder %s3989_s18, 0 }
  0xb0   : > { %3303 = dma.done.wait (%p4010_p7), %s572_s19, 48  }
  0xb1   : > { %3305 = vsyncadd (%p4010_p7), %s572_s19, 4294967248  ;;  %p672_p2 = scmp.lt.s32.totalorder %s3447_s17, 1  ;;  %s4011_s2 = sld [smem:[#allocation22_spill]] }
  0xb2   : > { %s4012_s4 = sld [smem:[#allocation23_spill]]  ;;  %s4013_s18 = sld [smem:[#allocation25_spill]] }
  0xb3   : > { %s3651_s28 = scalar_select %p672_p2, %s3447_s17, 1 }
  0xb4   : > { %s590_s0 = scalar_lea.vmem [#allocation11], %s3642_s27  ;;  %p4016_p9 = scmp.ne.s32.totalorder %s3447_s17, 0 }
  0xb5   : > { %s2786_s16 = sshll.u32 %s3651_s28, 4  ;;  %s2789_s19 = sshll.u32 %s3651_s28, 5  ;;  %v712_v0 = vld [vmem:[#allocation4] sm:$0xf] (!%p4016_p9)  ;;  %vm713_vm0 = vcmask (!%p4016_p9), 257024   ;;  %vm721_vm1 = vcmask (!%p4016_p9), 261124  }
  0xb6   : > { %s3673_s26 = scalar_lea.vmem %s3958_s8, %s2786_s16  ;;  %s700_s21 = scalar_lea.vmem %s3961_s11, %s3651_s28  ;;  %714 = vst.msk [vmem:[#allocation2] sm:$0xf] (!%p4016_p9), %vm713_vm0, %v712_v0  ;;  %v3050_v1 = vld [vmem:[#allocation4 + $0x4] ss:$0 sps:$4 sm:$0xff] (!%p4016_p9)  }
  0xb7   : > { %s676_s22 = scalar_lea.vmem %s4011_s2, %s2786_s16  ;;  %s4014_s2 = sld [smem:[#allocation26_spill]]  ;;  %722 = vst.msk [vmem:[#allocation2] sm:$0xf0] (!%p4016_p9), %vm721_vm1, %v3050_v1 }
  0xb8   : > { %s3664_s6 = scalar_lea.vmem %s4012_s4, %s2786_s16  ;;  %s3683_s10 = scalar_lea.vmem %s4013_s18, %s2789_s19 }
  0xb9   : > { %s4015_s4 = sld [smem:[#allocation27_spill]]  ;;  %s582_s16 = scalar_lea.vmem [#allocation10], %s3642_s27 }
  0xba   : > { %711 = sbr.rel (%p4016_p9) target bundleno = 193 (0xc1), region = 100 }
  0xbd   : > { %s703_s14 = scalar_lea.vmem %s4014_s2, %s3651_s28 }
  0xbf   : > { %s706_s23 = scalar_lea.vmem %s4015_s4, %s3651_s28 }
  0xc1 PF: > { %v3051_v2 = vld [vmem:[%s676_s22] sm:$0xff]   ;;  %v3335_v3 = vmov 0.0   ;;  %v3052_v4 = vld [vmem:[%s676_s22 + $0x8] sm:$0xff]   ;;  %vm3336_vm2 = vmmov 0   ;;  %vm747_vm3 = vcmask 261120   ;;  %s4017_s4 = scalar_lea.vmem %s3953_s3, %s3651_s28  ;;  %s3337_s24 = smov 64  }
  0xc2   : > { %2836 = vmatprep.subr.bf16.mxu0 %v3335_v3  ;;  %2849 = vmatprep.subr.mxu1 %v3335_v3  ;;  %v3704_v5 = vld [vmem:[#allocation2] sm:$0xff]  ;;  %s3338_s18 = smov 96   ;;  %s3339_s22 = smov 88   ;;  %vm796_vm4 = vcmask 64512   ;;  %v3739_v15 = vld [vmem:[#allocation7] sm:$0xff]  ;;  %vm959_vm5 = vcmask 60416  }
  0xc3   : > { %2837 = vmatpush3.bf16.msra.mxu0 %v3051_v2  ;;  %2840 = vmatprep.mubr.msk.bf16.mxu0 %vm3336_vm2, %v3335_v3  ;;  %v2734_v6 = vld [vmem:[%s4017_s4] ss:$0 sm:$0xff]  ;;  %s3340_s20 = smov 120   ;;  %s3341_s19 = smov 80   ;;  %vm1647_vm6 = vcmask 64516   ;;  %vm1131_vm7 = vcmask 126016  }
  0xc4   : > { %2838 = vmatprep.subr.bf16.mxu0 %v3335_v3  ;;  %2851 = vmatprep.mubr.msk.f32.mxu1 %vm3336_vm2, %v3335_v3  ;;  %s3342_s13 = smov 112   ;;  %s3343_s25 = smov 104   ;;  %v1478_v55 = vld [vmem:[#allocation7 + $0x8] sm:$0xff]  ;;  %vm1303_vm8 = vcmask 191616   ;;  %vm1475_vm9 = vcmask 257216   ;;  %vm1820_vm10 = vcmask 130116  }
  0xc5   : > { %s3344_s15 = smov 72   ;;  %s3345_s12 = smov 48   ;;  %vm1993_vm11 = vcmask 195716   ;;  %vm2166_vm12 = vcmask 261316   ;;  %vm2404_vm13 = vcmask 523264  }
  0xc6   : > { %s3346_s29 = smov 40   ;;  %s3347_s1 = smov 56  }
  0xc7   : > { %2839 = vmatpush3.bf16.msra.mxu0 %v3052_v4  ;;  %s3348_s2 = smov 8   ;;  %s3349_s4 = smov 16  }
  0xc8   : > { %2844 = vmatprep.subr.mxu0 %v3335_v3  ;;  %p2780_p1 = scmp.ne.s32.totalorder %s3447_s17, 1 }
  0xc9   : > { %vm2502_vm14 = vcmask (!%p2780_p1), 257024  }
  0xca   : > { %2841 = vmatmul.mubr.msk.bf16.vlgmr.msra.gmra.mrb[0].mxu0 %vm747_vm3, %v3704_v5 }
  0xcb   : > { %2846 = vmatprep.mubr.msk.f32.mxu0 %vm3336_vm2, %v3335_v3 }
 0x19d   : > { %v785_v7 = vpop.f32.mrb[0].mxu0 }
 0x19e   : > { %v3716_v8 = vadd.f32 %v2734_v6, %v785_v7  ;;  %v2842_v9 = vpop.f32.mrb[1].mxu0 }
 0x19f   : > { %v788_v10 = vpop.f32.mrb[2].mxu0 }
 0x1a0   : > { %v3718_v11 = vadd.f32 %v2734_v6, %v788_v10  ;;  %882 = vrot.lane.b32.xlu1 %v3716_v8, %s3337_s24  ;;  %794 = vrot.lane.b32.xlu0 %v3716_v8, %s3338_s18  ;;  %v2843_v12 = vpop.f32.mrb[3].mxu0 }
 0x1a4   : > { %963 = vrot.lane.b32.xlu1 %v3716_v8, %s3339_s22 }
 0x1a8   : > { %961 = vrot.lane.b32.xlu1 %v3716_v8, %s3340_s20 }
 0x1ac   : > { %1135 = vrot.lane.b32.xlu1 %v3716_v8, %s3341_s19 }
 0x1b0   : > { %1133 = vrot.lane.b32.xlu1 %v3716_v8, %s3342_s13 }
 0x1b4   : > { %1305 = vrot.lane.b32.xlu1 %v3716_v8, %s3343_s25 }
 0x212   : > { %v883_v13 = vpop.permute.xlu1 %882  ;;  %v795_v14 = vpop.permute.xlu0 %794 }
 0x213   : > { %2845 = vmatpush3.xpose.msk.msra.mxu0 %vm796_vm4, %v795_v14  ;;  %2850 = vmatpush3.msra.mxu1 %v883_v13 }
 0x214   : > { %2854 = vmatprep.subr.mxu1 %v3335_v3  ;;  %2859 = vmatprep.subr.mxu0 %v3335_v3 }
 0x216   : > { %2847 = vmatmul.mubr.msk.f32.vlgmr.msra.gmra.mrb[4].mxu0 %vm796_vm4, %v3716_v8  ;;  %v964_v25 = vpop.permute.xlu1 %963 }
 0x217   : > { %2861 = vmatprep.mubr.msk.f32.mxu0 %vm3336_vm2, %v3335_v3 }
 0x21a   : > { %v962_v26 = vpop.permute.xlu1 %961 }
 0x21e   : > { %v1136_v27 = vpop.permute.xlu1 %1135 }
 0x222   : > { %v1134_v28 = vpop.permute.xlu1 %1133 }
 0x226   : > { %v1306_v29 = vpop.permute.xlu1 %1305 }
 0x2e9   : > { %v867_v16 = vpop.f32.mrb[4].mxu0 }
 0x2ea   : > { %v868_v17 = vadd.f32 %v867_v16, %v3739_v15  ;;  %v2848_v18 = vpop.f32.mrb[5].mxu0 }
 0x2ec   : > { %v871_v19 = vsel %vm796_vm4, %v868_v17, -inf }
 0x2ed   : > { %872 = vmax.xlane.f32.xlu0 %v871_v19 }
 0x303   : > { %1307 = vrot.lane.b32.xlu0 %v3716_v8, %s3344_s15 }
 0x307   : > { %1822 = vrot.lane.b32.xlu0 %v3718_v11, %s3342_s13 }
 0x30b   : > { %1995 = vrot.lane.b32.xlu0 %v3718_v11, %s3343_s25 }
 0x37a   : > { %v873_v20 = vpop.xlane.xlu0 %872 }
 0x37b   : > { %v874_v21 = vsub.f32 %v868_v17, %v873_v20 }
 0x37d   : > { %v875_v22 = vmul.f32 1.442695, %v874_v21 }
 0x37e   : > { %v1308_v35 = vpop.permute.xlu0 %1307 }
 0x37f   : > { %3061 = vpow2.f32 %v875_v22 }
 0x382   : > { %v1823_v38 = vpop.permute.xlu0 %1822 }
 0x386   : > { %v1996_v40 = vpop.permute.xlu0 %1995 }
 0x389   : > { %v3062_v23 = vpop.eup %3061 }
 0x38a   : > { %v877_v24 = vsel %vm796_vm4, %v3062_v23, 0.0 }
 0x38b   : > { %878 = vadd.xlane.f32.xlu1 %v877_v24 }
 0x39c   : > { %1480 = vrot.lane.b32.xlu1 %v3718_v11, %s3338_s18  ;;  %s3350_s18 = smov 24  }
 0x3a0   : > { %1651 = vrot.lane.b32.xlu1 %v3718_v11, %s3339_s22 }
 0x3a4   : > { %1649 = vrot.lane.b32.xlu1 %v3718_v11, %s3340_s20  ;;  %s4018_s20 = scalar_lea.vmem %s3955_s5, %s3651_s28 }
 0x3a8   : > { %1824 = vrot.lane.b32.xlu1 %v3718_v11, %s3341_s19  ;;  %s4019_s19 = scalar_lea.vmem [#allocation9], %s3642_s27 }
 0x3ac   : > { %1997 = vrot.lane.b32.xlu1 %v3718_v11, %s3344_s15 }
 0x418   : > { %v879_v30 = vpop.xlane.xlu1 %878 }
 0x419   : > { %3063 = vrcp.f32 %v879_v30 }
 0x41c   : > { %v1481_v33 = vpop.permute.xlu1 %1480 }
 0x420   : > { %v1652_v34 = vpop.permute.xlu1 %1651 }
 0x423   : > { %v3064_v31 = vpop.eup %3063 }
 0x424   : > { %v881_v32 = vmul.f32 %v3064_v31, %v3062_v23  ;;  %v1650_v36 = vpop.permute.xlu1 %1649 }
 0x426   : > { %2852 = vmatmul.mubr.msk.f32.vlgmr.msra.gmra.mrb[0].mxu1 %vm796_vm4, %v881_v32 }
 0x427   : > { %2855 = vmatpush3.xpose.msk.msra.mxu1 %vm796_vm4, %v964_v25  ;;  %2856 = vmatprep.mubr.msk.f32.mxu1 %vm3336_vm2, %v3335_v3 }
 0x428   : > { %2864 = vmatprep.subr.mxu1 %v3335_v3  ;;  %v1825_v37 = vpop.permute.xlu1 %1824 }
 0x42a   : > { %2857 = vmatmul.mubr.msk.f32.vlgmr.msra.gmra.mrb[2].mxu1 %vm796_vm4, %v962_v26 }
 0x42b   : > { %2865 = vmatpush3.xpose.msk.msra.mxu1 %vm796_vm4, %v1136_v27  ;;  %2866 = vmatprep.mubr.msk.f32.mxu1 %vm3336_vm2, %v3335_v3 }
 0x42c   : > { %2874 = vmatprep.subr.mxu1 %v3335_v3  ;;  %v1998_v39 = vpop.permute.xlu1 %1997 }
 0x42e   : > { %2867 = vmatmul.mubr.msk.f32.vlgmr.msra.gmra.mrb[4].mxu1 %vm796_vm4, %v1134_v28 }
 0x42f   : > { %2875 = vmatpush3.xpose.msk.msra.mxu1 %vm796_vm4, %v1308_v35  ;;  %2876 = vmatprep.mubr.msk.f32.mxu1 %vm3336_vm2, %v3335_v3 }
 0x430   : > { %2884 = vmatprep.subr.mxu1 %v3335_v3 }
 0x432   : > { %2877 = vmatmul.mubr.msk.f32.vlgmr.msra.gmra.mrb[6].mxu1 %vm796_vm4, %v1306_v29 }
 0x433   : > { %2885 = vmatpush3.xpose.msk.msra.mxu1 %vm796_vm4, %v1481_v33  ;;  %2886 = vmatprep.mubr.msk.f32.mxu1 %vm3336_vm2, %v3335_v3 }
 0x434   : > { %2894 = vmatprep.subr.mxu1 %v3335_v3 }
 0x436   : > { %2887 = vmatmul.mubr.msk.f32.vlgmr.msra.gmra.mrb[8].mxu1 %vm796_vm4, %v3718_v11 }
 0x437   : > { %2895 = vmatpush3.xpose.msk.msra.mxu1 %vm796_vm4, %v1652_v34  ;;  %2896 = vmatprep.mubr.msk.f32.mxu1 %vm3336_vm2, %v3335_v3 }
 0x438   : > { %2904 = vmatprep.subr.mxu1 %v3335_v3 }
 0x43a   : > { %2897 = vmatmul.mubr.msk.f32.vlgmr.msra.gmra.mrb[10].mxu1 %vm796_vm4, %v1650_v36 }
 0x43b   : > { %2905 = vmatpush3.xpose.msk.msra.mxu1 %vm796_vm4, %v1825_v37  ;;  %2906 = vmatprep.mubr.msk.f32.mxu1 %vm3336_vm2, %v3335_v3 }
 0x43c   : > { %2914 = vmatprep.subr.mxu1 %v3335_v3 }
 0x43e   : > { %2907 = vmatmul.mubr.msk.f32.vlgmr.msra.gmra.mrb[12].mxu1 %vm796_vm4, %v1823_v38 }
 0x43f   : > { %2915 = vmatpush3.xpose.msk.msra.mxu1 %vm796_vm4, %v1998_v39  ;;  %2916 = vmatprep.mubr.msk.f32.mxu1 %vm3336_vm2, %v3335_v3 }
 0x440   : > { %2924 = vmatprep.subr.bf16.mxu1 %v3335_v3 }
 0x442   : > { %2917 = vmatmul.mubr.msk.f32.vlgmr.msra.gmra.mrb[14].mxu1 %vm796_vm4, %v1996_v40 }
 0x443   : > { %2928 = vmatprep.mubr.msk.bf16.mxu1 %vm3336_vm2, %v3335_v3 }
 0x4f9   : > { %v954_v41 = vpop.f32.mrb[0].mxu1 }
 0x4fa   : > { %v958_v42 = vpack.c.bf16 %v954_v41, %v954_v41  ;;  %v2853_v43 = vpop.f32.mrb[1].mxu1 }
 0x4fc   : > { %960 = vst.msk [vmem:[#allocation3] sm:$0xf] %vm959_vm5, %v958_v42 }
 0x4fd   : > { %v1035_v44 = vpop.f32.mrb[2].mxu1 }
 0x4fe   : > { %v1036_v45 = vadd.f32 %v1035_v44, %v3739_v15  ;;  %v2858_v46 = vpop.f32.mrb[3].mxu1 }
 0x500   : > { %v1039_v47 = vsel %vm796_vm4, %v1036_v45, -inf }
 0x501   : > { %1040 = vmax.xlane.f32.xlu1 %v1039_v47  ;;  %v1207_v48 = vpop.f32.mrb[4].mxu1 }
 0x502   : > { %v1208_v49 = vadd.f32 %v1207_v48, %v3739_v15  ;;  %v2868_v50 = vpop.f32.mrb[5].mxu1 }
 0x504   : > { %v1211_v51 = vsel %vm796_vm4, %v1208_v49, -inf }
 0x505   : > { %1212 = vmax.xlane.f32.xlu0 %v1211_v51  ;;  %v1379_v52 = vpop.f32.mrb[6].mxu1 }
 0x506   : > { %v1380_v53 = vadd.f32 %v1379_v52, %v3739_v15  ;;  %v2878_v54 = vpop.f32.mrb[7].mxu1 }
 0x508   : > { %v1383_v56 = vsel %vm796_vm4, %v1380_v53, -inf }
 0x509   : > { %1384 = vmax.xlane.f32.xlu0 %v1383_v56  ;;  %v1552_v57 = vpop.f32.mrb[8].mxu1 }
 0x50a   : > { %v1553_v58 = vadd.f32 %v1552_v57, %v1478_v55  ;;  %v2888_v59 = vpop.f32.mrb[9].mxu1 }
 0x50c   : > { %v1556_v60 = vsel %vm796_vm4, %v1553_v58, -inf }
 0x50d   : > { %1557 = vmax.xlane.f32.xlu1 %v1556_v60  ;;  %v1723_v61 = vpop.f32.mrb[10].mxu1 }
 0x50e   : > { %v1724_v62 = vadd.f32 %v1723_v61, %v1478_v55  ;;  %v2898_v63 = vpop.f32.mrb[11].mxu1 }
 0x510   : > { %v1727_v0 = vsel %vm796_vm4, %v1724_v62, -inf }
 0x511   : > { %1728 = vmax.xlane.f32.xlu0 %v1727_v0  ;;  %v1896_v1 = vpop.f32.mrb[12].mxu1 }
 0x512   : > { %v1897_v2 = vadd.f32 %v1896_v1, %v1478_v55  ;;  %v2908_v4 = vpop.f32.mrb[13].mxu1 }
 0x514   : > { %v1900_v6 = vsel %vm796_vm4, %v1897_v2, -inf }
 0x515   : > { %1901 = vmax.xlane.f32.xlu1 %v1900_v6  ;;  %v2069_v7 = vpop.f32.mrb[14].mxu1 }
 0x516   : > { %v2070_v9 = vadd.f32 %v2069_v7, %v1478_v55  ;;  %v2918_v10 = vpop.f32.mrb[15].mxu1 }
 0x518   : > { %v2073_v12 = vsel %vm796_vm4, %v2070_v9, -inf }
 0x519   : > { %2074 = vmax.xlane.f32.xlu0 %v2073_v12 }
 0x526   : > { %1222 = vrot.lane.b32.xlu1 %v3716_v8, %s3345_s12 }
 0x52a   : > { %1394 = vrot.lane.b32.xlu1 %v3716_v8, %s3346_s29 }
 0x52f   : > { %1050 = vrot.lane.b32.xlu0 %v3716_v8, %s3347_s1 }
 0x58e   : > { %v1041_v13 = vpop.xlane.xlu1 %1040 }
 0x58f   : > { %v1042_v14 = vsub.f32 %v1036_v45, %v1041_v13 }
 0x591   : > { %v1043_v15 = vmul.f32 1.442695, %v1042_v14 }
 0x592   : > { %v1213_v16 = vpop.xlane.xlu0 %1212 }
 0x593   : > { %3065 = vpow2.f32 %v1043_v15  ;;  %v1214_v17 = vsub.f32 %v1208_v49, %v1213_v16 }
 0x595   : > { %v1215_v18 = vmul.f32 1.442695, %v1214_v17 }
 0x596   : > { %v1385_v20 = vpop.xlane.xlu0 %1384 }
 0x597   : > { %3067 = vpow2.f32 %v1215_v18  ;;  %v1386_v26 = vsub.f32 %v1380_v53, %v1385_v20 }
 0x599   : > { %v1387_v29 = vmul.f32 1.442695, %v1386_v26 }
 0x59a   : > { %v1558_v27 = vpop.xlane.xlu1 %1557 }
 0x59b   : > { %v1559_v28 = vsub.f32 %v1553_v58, %v1558_v27  ;;  %3069 = vpow2.f32 %v1387_v29  ;;  %v3053_v27 = vld [vmem:[%s3664_s6] sm:$0xff]  }
 0x59c   : > { %2925 = vmatpush3.bf16.msra.mxu1 %v3053_v27  ;;  %v3058_v27 = vld [vmem:[%s3683_s10 + $0x8] sm:$0xff]  }
 0x59d   : > { %v3066_v19 = vpop.eup %3065  ;;  %v1560_v32 = vmul.f32 1.442695, %v1559_v28  ;;  %2926 = vmatprep.subr.bf16.mxu1 %v3335_v3 }
 0x59e   : > { %v1045_v21 = vsel %vm796_vm4, %v3066_v19, 0.0  ;;  %v1729_v23 = vpop.xlane.xlu0 %1728 }
 0x59f   : > { %1046 = vadd.xlane.f32.xlu1 %v1045_v21  ;;  %v1730_v30 = vsub.f32 %v1724_v62, %v1729_v23  ;;  %3071 = vpow2.f32 %v1560_v32 }
 0x5a1   : > { %v3068_v22 = vpop.eup %3067  ;;  %v1731_v34 = vmul.f32 1.442695, %v1730_v30  ;;  %v3054_v30 = vld [vmem:[%s3664_s6 + $0x8] sm:$0xff]  }
 0x5a2   : > { %v1217_v24 = vsel %vm796_vm4, %v3068_v22, 0.0  ;;  %v1902_v31 = vpop.xlane.xlu1 %1901  ;;  %2927 = vmatpush3.bf16.msra.mxu1 %v3054_v30  ;;  %v2768_v30 = vld [vmem:[%s590_s0] ss:$0 sm:$0xff] }
 0x5a3   : > { %1218 = vadd.xlane.f32.xlu0 %v1217_v24  ;;  %v1903_v33 = vsub.f32 %v1897_v2, %v1902_v31  ;;  %3073 = vpow2.f32 %v1731_v34  ;;  %2940 = vmatprep.subr.bf16.mxu1 %v3335_v3 }
 0x5a5   : > { %v1904_v36 = vmul.f32 1.442695, %v1903_v33  ;;  %v3070_v38 = vpop.eup %3069 }
 0x5a6   : > { %v2075_v25 = vpop.xlane.xlu0 %2074  ;;  %v1389_v40 = vsel %vm796_vm4, %v3070_v38, 0.0  ;;  %v1223_v48 = vpop.permute.xlu1 %1222 }
 0x5a7   : > { %v2076_v35 = vsub.f32 %v2070_v9, %v2075_v25  ;;  %3075 = vpow2.f32 %v1904_v36 }
 0x5a9   : > { %v2077_v37 = vmul.f32 1.442695, %v2076_v35  ;;  %v3072_v39 = vpop.eup %3071 }
 0x5aa   : > { %v1051_v8 = vpop.permute.xlu0 %1050  ;;  %v1562_v43 = vsel %vm796_vm4, %v3072_v39, 0.0  ;;  %v1395_v49 = vpop.permute.xlu1 %1394 }
 0x5ab   : > { %2860 = vmatpush3.msra.mxu0 %v1051_v8  ;;  %3077 = vpow2.f32 %v2077_v37 }
 0x5ac   : > { %2869 = vmatprep.subr.mxu0 %v3335_v3 }
 0x5ad   : > { %v3074_v41 = vpop.eup %3073 }
 0x5ae   : > { %v1733_v44 = vsel %vm796_vm4, %v3074_v41, 0.0 }
 0x5b0   : > { %1738 = vrot.lane.b32.xlu1 %v3718_v11, %s3347_s1 }
 0x5b1   : > { %v3076_v42 = vpop.eup %3075 }
 0x5b2   : > { %v1906_v46 = vsel %vm796_vm4, %v3076_v42, 0.0 }
 0x5b5   : > { %v3819_v45 = vpop.eup %3077 }
 0x5b6   : > { %v2079_v47 = vsel %vm796_vm4, %v3819_v45, 0.0 }
 0x5b9   : > { %1567 = vrot.lane.b32.xlu0 %v3718_v11, %s3337_s24 }
 0x5d4   : > { %1390 = vadd.xlane.f32.xlu1 %v1389_v40 }
 0x5d8   : > { %1563 = vadd.xlane.f32.xlu0 %v1562_v43  ;;  %1734 = vadd.xlane.f32.xlu1 %v1733_v44 }
 0x5dc   : > { %1907 = vadd.xlane.f32.xlu0 %v1906_v46  ;;  %2080 = vadd.xlane.f32.xlu1 %v2079_v47  ;;  %v2762_v47 = vld [vmem:[%s4018_s20] ss:$0 sm:$0xff] }
 0x5ed   : > { %2084 = vrot.lane.b32.xlu1 %v3718_v11, %s3346_s29 }
 0x5f2   : > { %1911 = vrot.lane.b32.xlu0 %v3718_v11, %s3345_s12 }
 0x62c   : > { %v1047_v50 = vpop.xlane.xlu1 %1046 }
 0x62d   : > { %3079 = vrcp.f32 %v1047_v50 }
 0x630   : > { %v1219_v51 = vpop.xlane.xlu0 %1218  ;;  %v1739_v11 = vpop.permute.xlu1 %1738 }
 0x631   : > { %3081 = vrcp.f32 %v1219_v51 }
 0x634   : > { %v1568_v56 = vpop.permute.xlu0 %1567 }
 0x637   : > { %v3080_v52 = vpop.eup %3079 }
 0x638   : > { %v1049_v53 = vmul.f32 %v3080_v52, %v3066_v19  ;;  %v2169_v52 = vunpack.c.h.bf16 %v3704_v5 }
 0x63a   : > { %2862 = vmatmul.mubr.msk.f32.vlgmr.msra.gmra.mrb[6].mxu0 %vm796_vm4, %v1049_v53 }
 0x63b   : > { %v3082_v54 = vpop.eup %3081  ;;  %2870 = vmatpush3.msra.mxu0 %v1223_v48  ;;  %2871 = vmatprep.mubr.msk.f32.mxu0 %vm3336_vm2, %v3335_v3  ;;  %v2168_v48 = vunpack.c.l.bf16 %v3704_v5 }
 0x63c   : > { %v1221_v55 = vmul.f32 %v3082_v54, %v3068_v22  ;;  %2879 = vmatprep.subr.mxu0 %v3335_v3 }
 0x63e   : > { %2872 = vmatmul.mubr.msk.f32.vlgmr.msra.gmra.mrb[8].mxu0 %vm796_vm4, %v1221_v55 }
 0x63f   : > { %2880 = vmatpush3.msra.mxu0 %v1395_v49  ;;  %2881 = vmatprep.mubr.msk.f32.mxu0 %vm3336_vm2, %v3335_v3 }
 0x640   : > { %2889 = vmatprep.subr.mxu0 %v3335_v3 }
 0x661   : > { %v1391_v57 = vpop.xlane.xlu1 %1390 }
 0x662   : > { %3083 = vrcp.f32 %v1391_v57 }
 0x665   : > { %v1564_v58 = vpop.xlane.xlu0 %1563  ;;  %v1735_v59 = vpop.xlane.xlu1 %1734 }
 0x666   : > { %3085 = vrcp.f32 %v1564_v58 }
 0x667   : > { %3087 = vrcp.f32 %v1735_v59 }
 0x669   : > { %v1908_v60 = vpop.xlane.xlu0 %1907  ;;  %v2081_v63 = vpop.xlane.xlu1 %2080 }
 0x66a   : > { %3089 = vrcp.f32 %v1908_v60 }
 0x66b   : > { %3091 = vrcp.f32 %v2081_v63 }
 0x66c   : > { %v3084_v61 = vpop.eup %3083 }
 0x66d   : > { %v1393_v62 = vmul.f32 %v3084_v61, %v3070_v38  ;;  %v1912_v7 = vpop.permute.xlu0 %1911  ;;  %v2085_v12 = vpop.permute.xlu1 %2084 }
 0x66f   : > { %2882 = vmatmul.mubr.msk.f32.vlgmr.msra.gmra.mrb[10].mxu0 %vm796_vm4, %v1393_v62 }
 0x670   : > { %2890 = vmatpush3.msra.mxu0 %v1568_v56  ;;  %2891 = vmatprep.mubr.msk.f32.mxu0 %vm3336_vm2, %v3335_v3  ;;  %v3086_v0 = vpop.eup %3085 }
 0x671   : > { %2899 = vmatprep.subr.mxu0 %v3335_v3  ;;  %v1566_v1 = vmul.f32 %v3086_v0, %v3072_v39  ;;  %v3088_v2 = vpop.eup %3087 }
 0x672   : > { %v1737_v4 = vmul.f32 %v3088_v2, %v3074_v41 }
 0x673   : > { %2892 = vmatmul.mubr.msk.f32.vlgmr.msra.gmra.mrb[12].mxu0 %vm796_vm4, %v1566_v1 }
 0x674   : > { %2900 = vmatpush3.msra.mxu0 %v1739_v11  ;;  %2901 = vmatprep.mubr.msk.f32.mxu0 %vm3336_vm2, %v3335_v3  ;;  %v3090_v6 = vpop.eup %3089 }
 0x675   : > { %2909 = vmatprep.subr.mxu0 %v3335_v3  ;;  %v1910_v9 = vmul.f32 %v3090_v6, %v3076_v42  ;;  %v3092_v10 = vpop.eup %3091  ;;  %v3055_v6 = vld [vmem:[%s3673_s26] sm:$0xff]  }
 0x676   : > { %v2083_v13 = vmul.f32 %v3092_v10, %v3819_v45 }
 0x677   : > { %2902 = vmatmul.mubr.msk.f32.vlgmr.msra.gmra.mrb[14].mxu0 %vm796_vm4, %v1737_v4 }
 0x678   : > { %2910 = vmatpush3.msra.mxu0 %v1912_v7  ;;  %2911 = vmatprep.mubr.msk.f32.mxu0 %vm3336_vm2, %v3335_v3  ;;  %v3056_v7 = vld [vmem:[%s3673_s26 + $0x8] sm:$0xff]  }
 0x679   : > { %2919 = vmatprep.subr.mxu0 %v3335_v3 }
 0x67b   : > { %2912 = vmatmul.mubr.msk.f32.vlgmr.msra.gmra.mrb[16].mxu0 %vm796_vm4, %v1910_v9 }
 0x67c   : > { %2920 = vmatpush3.msra.mxu0 %v2085_v12  ;;  %2921 = vmatprep.mubr.msk.f32.mxu0 %vm3336_vm2, %v3335_v3 }
 0x67d   : > { %2932 = vmatprep.subr.bf16.mxu0 %v3335_v3 }
 0x67f   : > { %2922 = vmatmul.mubr.msk.f32.vlgmr.msra.gmra.mrb[18].mxu0 %vm796_vm4, %v2083_v13 }
 0x680   : > { %2936 = vmatprep.mubr.msk.bf16.mxu0 %vm3336_vm2, %v3335_v3  ;;  %2933 = vmatpush3.bf16.msra.mxu0 %v3055_v6 }
 0x681   : > { %2934 = vmatprep.subr.bf16.mxu0 %v3335_v3 }
 0x684   : > { %2935 = vmatpush3.bf16.msra.mxu0 %v3056_v7 }
 0x70d   : > { %v1122_v14 = vpop.f32.mrb[6].mxu0 }
 0x70e   : > { %v1126_v15 = vpack.c.bf16 %v1122_v14, %v1122_v14  ;;  %v2863_v16 = vpop.f32.mrb[7].mxu0 }
 0x710   : > { %1128 = vrot.lane.b32.xlu0 %v1126_v15, %s3348_s2 }
 0x711   : > { %v1294_v17 = vpop.f32.mrb[8].mxu0 }
 0x712   : > { %v1298_v18 = vpack.c.bf16 %v1294_v17, %v1294_v17  ;;  %v2873_v19 = vpop.f32.mrb[9].mxu0 }
 0x714   : > { %1300 = vrot.lane.b32.xlu0 %v1298_v18, %s3349_s4  ;;  %v2766_v18 = vld [vmem:[%s4019_s19] ss:$0 sm:$0xff] }
 0x742   : > { %v1466_v20 = vpop.f32.mrb[10].mxu0 }
 0x743   : > { %v1470_v21 = vpack.c.bf16 %v1466_v20, %v1466_v20  ;;  %v2883_v22 = vpop.f32.mrb[11].mxu0 }
 0x744   : > { %v2767_v22 = vld [vmem:[%s582_s16] ss:$0 sm:$0xff] }
 0x745   : > { %1472 = vrot.lane.b32.xlu0 %v1470_v21, %s3350_s18 }
 0x746   : > { %v1639_v23 = vpop.f32.mrb[12].mxu0 }
 0x747   : > { %v1643_v24 = vpack.c.bf16 %v1639_v23, %v1639_v23  ;;  %v2893_v25 = vpop.f32.mrb[13].mxu0 }
 0x749   : > { %v1645_v8 = vrot.slane %v1643_v24, 4 }
 0x74a   : > { %v1810_v26 = vpop.f32.mrb[14].mxu0 }
 0x74b   : > { %1648 = vst.msk [vmem:[#allocation3] sm:$0xf0] %vm1647_vm6, %v1645_v8  ;;  %v1814_v28 = vpack.c.bf16 %v1810_v26, %v1810_v26  ;;  %v2903_v29 = vpop.f32.mrb[15].mxu0  ;;  %v3057_v26 = vld [vmem:[%s3683_s10] sm:$0xff]  }
 0x74c   : > { %v3060_v29 = vld [vmem:[%s3683_s10 + $0x18] sm:$0xff]  }
 0x74d   : > { %v1816_v31 = vrot.slane %v1814_v28, 4  ;;  %v3059_v28 = vld [vmem:[%s3683_s10 + $0x10] sm:$0xff]  }
 0x74e   : > { %v1983_v32 = vpop.f32.mrb[16].mxu0 }
 0x74f   : > { %v1987_v33 = vpack.c.bf16 %v1983_v32, %v1983_v32  ;;  %1817 = vrot.lane.b32.xlu1 %v1816_v31, %s3348_s2  ;;  %v2913_v34 = vpop.f32.mrb[17].mxu0 }
 0x751   : > { %v1989_v35 = vrot.slane %v1987_v33, 4 }
 0x752   : > { %v2156_v36 = vpop.f32.mrb[18].mxu0 }
 0x753   : > { %v2160_v37 = vpack.c.bf16 %v2156_v36, %v2156_v36  ;;  %1990 = vrot.lane.b32.xlu1 %v1989_v35, %s3349_s4  ;;  %v2923_v38 = vpop.f32.mrb[19].mxu0 }
 0x755   : > { %v2162_v39 = vrot.slane %v2160_v37, 4 }
 0x757   : > { %2163 = vrot.lane.b32.xlu1 %v2162_v39, %s3350_s18 }
 0x782   : > { %v1129_v40 = vpop.permute.xlu0 %1128 }
 0x783   : > { %1132 = vst.msk [vmem:[#allocation3] sm:$0xf] %vm1131_vm7, %v1129_v40 }
 0x786   : > { %v1301_v41 = vpop.permute.xlu0 %1300 }
 0x787   : > { %1304 = vst.msk [vmem:[#allocation3] sm:$0xf] %vm1303_vm8, %v1301_v41 }
 0x7b7   : > { %v1473_v42 = vpop.permute.xlu0 %1472 }
 0x7b8   : > { %1476 = vst.msk [vmem:[#allocation3] sm:$0xf] %vm1475_vm9, %v1473_v42 }
 0x7c1   : > { %v1818_v43 = vpop.permute.xlu1 %1817 }
 0x7c2   : > { %1821 = vst.msk [vmem:[#allocation3] sm:$0xf0] %vm1820_vm10, %v1818_v43 }
 0x7c5   : > { %v1991_v44 = vpop.permute.xlu1 %1990 }
 0x7c6   : > { %1994 = vst.msk [vmem:[#allocation3] sm:$0xf0] %vm1993_vm11, %v1991_v44 }
 0x7c9   : > { %v2164_v45 = vpop.permute.xlu1 %2163 }
 0x7ca   : > { %2167 = vst.msk [vmem:[#allocation3] sm:$0xf0] %vm2166_vm12, %v2164_v45 }
 0x7d1   : > { %v2170_v46 = vld [vmem:[#allocation3] sm:$0xff] }
 0x7d2   : > { %2929 = vmatmul.mubr.msk.bf16.vlgmr.msra.gmra.mrb[16].mxu1 %vm747_vm3, %v2170_v46 }
 0x7d3   : > { %2948 = vmatprep.mubr.msk.bf16.mxu1 %vm3336_vm2, %v3335_v3  ;;  %2941 = vmatpush3.bf16.msra.mxu1 %v3057_v26 }
 0x7d4   : > { %2942 = vmatprep.subr.bf16.mxu1 %v3335_v3 }
 0x7d7   : > { %2943 = vmatpush3.bf16.msra.mxu1 %v3058_v27 }
 0x7d8   : > { %2944 = vmatprep.subr.bf16.mxu1 %v3335_v3 }
 0x7db   : > { %2945 = vmatpush3.bf16.msra.mxu1 %v3059_v28 }
 0x7dc   : > { %2946 = vmatprep.subr.bf16.mxu1 %v3335_v3 }
 0x7df   : > { %2947 = vmatpush3.bf16.msra.mxu1 %v3060_v29 }
 0x8a5   : > { %v2231_v49 = vpop.f32.mrb[16].mxu1 }
 0x8a6   : > { %v2232_v50 = vadd.f32 %v2762_v47, %v2231_v49  ;;  %v2930_v51 = vpop.f32.mrb[17].mxu1 }
 0x8a7   : > { %v2234_v53 = vpop.f32.mrb[18].mxu1 }
 0x8a8   : > { %v2235_v54 = vadd.f32 %v2762_v47, %v2234_v53  ;;  %v2931_v55 = vpop.f32.mrb[19].mxu1  ;;  %v2238_v11 = vadd.f32 %v2232_v50, %v2168_v48  ;;  %v2772_v47 = vld [vmem:[%s700_s21] ss:$0 sm:$0xff] }
 0x8aa   : > { %v2242_v56 = vsel %vm747_vm3, %v2238_v11, 0.0  ;;  %v2239_v57 = vadd.f32 %v2235_v54, %v2169_v52 }
 0x8ab   : > { %2243 = vadd.xlane.f32.xlu0 %v2242_v56 }
 0x8ac   : > { %v2245_v58 = vsel %vm747_vm3, %v2239_v57, 0.0 }
 0x8ad   : > { %2246 = vadd.xlane.f32.xlu1 %v2245_v58 }
 0x938   : > { %v2244_v59 = vpop.xlane.xlu0 %2243 }
 0x939   : > { %v2249_v60 = vmul.f32 0.03125, %v2244_v59 }
 0x93a   : > { %v2247_v61 = vpop.xlane.xlu1 %2246 }
 0x93b   : > { %v2251_v62 = vsub.f32 %v2238_v11, %v2249_v60  ;;  %v2250_v63 = vmul.f32 0.03125, %v2247_v61 }
 0x93d   : > { %v2252_v0 = vsub.f32 %v2239_v57, %v2250_v63  ;;  %v2253_v5 = vmul.f32 %v2251_v62, %v2251_v62 }
 0x93f   : > { %v2255_v1 = vsel %vm747_vm3, %v2253_v5, 0.0  ;;  %v2254_v2 = vmul.f32 %v2252_v0, %v2252_v0 }
 0x940   : > { %2256 = vadd.xlane.f32.xlu0 %v2255_v1 }
 0x941   : > { %v2258_v4 = vsel %vm747_vm3, %v2254_v2, 0.0 }
 0x944   : > { %2259 = vadd.xlane.f32.xlu0 %v2258_v4 }
 0x9cd   : > { %v2257_v9 = vpop.xlane.xlu0 %2256 }
 0x9ce   : > { %v2261_v10 = vmul.f32 0.03125, %v2257_v9 }
 0x9d0   : > { %v2263_v12 = vadd.f32 1e-12, %v2261_v10 }
 0x9d1   : > { %v2260_v13 = vpop.xlane.xlu0 %2259 }
 0x9d2   : > { %3093 = vrsqrt.f32 %v2263_v12  ;;  %v2262_v14 = vmul.f32 0.03125, %v2260_v13  ;;  %v2778_v13 = vld [vmem:[%s703_s14] ss:$0 sm:$0xff] }
 0x9d4   : > { %v2264_v15 = vadd.f32 1e-12, %v2262_v14 }
 0x9d6   : > { %3095 = vrsqrt.f32 %v2264_v15 }
 0x9dc   : > { %v3094_v16 = vpop.eup %3093 }
 0x9dd   : > { %v2267_v17 = vmul.f32 %v3094_v16, %v2251_v62 }
 0x9df   : > { %v2275_v20 = vmul.f32 %v2766_v18, %v2267_v17 }
 0x9e0   : > { %v3096_v19 = vpop.eup %3095 }
 0x9e1   : > { %v2268_v21 = vmul.f32 %v3096_v19, %v2252_v0  ;;  %v2283_v24 = vadd.f32 %v2767_v22, %v2275_v20 }
 0x9e3   : > { %v2276_v23 = vmul.f32 %v2766_v18, %v2268_v21  ;;  %v2779_v18 = vld [vmem:[%s706_s23] ss:$0 sm:$0xff] }
 0x9e5   : > { %v2284_v25 = vadd.f32 %v2767_v22, %v2276_v23 }
 0x9e7   : > { %v2285_v8 = vpack.c.bf16 %v2284_v25, %v2283_v24 }
 0x9e9   : > { %2937 = vmatmul.mubr.msk.bf16.vlgmr.msra.gmra.mrb[20].mxu0 %vm747_vm3, %v2285_v8 }
 0xabc   : > { %v2346_v31 = vpop.f32.mrb[20].mxu0 }
 0xabd   : > { %v2347_v32 = vadd.f32 %v2768_v30, %v2346_v31  ;;  %v2938_v33 = vpop.f32.mrb[21].mxu0 }
 0xabe   : > { %v2349_v34 = vpop.f32.mrb[22].mxu0 }
 0xabf   : > { %v2356_v35 = vmul.f32 0.70710677, %v2347_v32  ;;  %v2350_v36 = vadd.f32 %v2768_v30, %v2349_v34  ;;  %v2939_v37 = vpop.f32.mrb[23].mxu0  ;;  %v2353_v42 = vmul.f32 0.5, %v2347_v32 }
 0xac1   : > { %3097 = verf.f32 %v2356_v35  ;;  %v2357_v38 = vmul.f32 0.70710677, %v2350_v36  ;;  %v2354_v3 = vmul.f32 0.5, %v2350_v36 }
 0xac3   : > { %3099 = verf.f32 %v2357_v38 }
 0xacb   : > { %v3098_v39 = vpop.eup %3097 }
 0xacc   : > { %v2360_v40 = vadd.f32 1.0, %v3098_v39 }
 0xacd   : > { %v3100_v41 = vpop.eup %3099 }
 0xace   : > { %v2361_v43 = vadd.f32 1.0, %v3100_v41  ;;  %v2362_v44 = vmul.f32 %v2360_v40, %v2353_v42 }
 0xad0   : > { %v2363_v45 = vmul.f32 %v2361_v43, %v2354_v3 }
 0xad2   : > { %v2364_v46 = vpack.c.bf16 %v2363_v45, %v2362_v44 }
 0xad4   : > { %2949 = vmatmul.mubr.msk.bf16.vlgmr.msra.gmra.mrb[20].mxu1 %vm2404_vm13, %v2364_v46 }
 0xba7   : > { %v2442_v48 = vpop.f32.mrb[20].mxu1 }
 0xba8   : > { %v2443_v49 = vadd.f32 %v2772_v47, %v2442_v48  ;;  %v2950_v50 = vpop.f32.mrb[21].mxu1 }
 0xba9   : > { %v2445_v51 = vpop.f32.mrb[22].mxu1 }
 0xbaa   : > { %v2446_v52 = vadd.f32 %v2772_v47, %v2445_v51  ;;  %v2951_v53 = vpop.f32.mrb[23].mxu1  ;;  %v2449_v54 = vadd.f32 %v2443_v49, %v2283_v24 }
 0xbac   : > { %v2453_v55 = vsel %vm747_vm3, %v2449_v54, 0.0  ;;  %v2450_v11 = vadd.f32 %v2446_v52, %v2284_v25 }
 0xbad   : > { %2454 = vadd.xlane.f32.xlu1 %v2453_v55 }
 0xbae   : > { %v2456_v56 = vsel %vm747_vm3, %v2450_v11, 0.0 }
 0xbaf   : > { %2457 = vadd.xlane.f32.xlu0 %v2456_v56 }
 0xc3a   : > { %v2455_v57 = vpop.xlane.xlu1 %2454 }
 0xc3b   : > { %v2459_v58 = vmul.f32 0.03125, %v2455_v57 }
 0xc3c   : > { %v2458_v59 = vpop.xlane.xlu0 %2457 }
 0xc3d   : > { %v2461_v60 = vsub.f32 %v2449_v54, %v2459_v58  ;;  %v2460_v61 = vmul.f32 0.03125, %v2458_v59 }
 0xc3f   : > { %v2462_v62 = vsub.f32 %v2450_v11, %v2460_v61  ;;  %v2463_v63 = vmul.f32 %v2461_v60, %v2461_v60 }
 0xc41   : > { %v2465_v0 = vsel %vm747_vm3, %v2463_v63, 0.0  ;;  %v2464_v5 = vmul.f32 %v2462_v62, %v2462_v62 }
 0xc42   : > { %2466 = vadd.xlane.f32.xlu1 %v2465_v0 }
 0xc43   : > { %v2468_v1 = vsel %vm747_vm3, %v2464_v5, 0.0 }
 0xc44   : > { %2469 = vadd.xlane.f32.xlu0 %v2468_v1 }
 0xccf   : > { %v2467_v2 = vpop.xlane.xlu1 %2466 }
 0xcd0   : > { %v2471_v4 = vmul.f32 0.03125, %v2467_v2 }
 0xcd1   : > { %v2470_v6 = vpop.xlane.xlu0 %2469 }
 0xcd2   : > { %v2473_v7 = vadd.f32 1e-12, %v2471_v4  ;;  %v2472_v9 = vmul.f32 0.03125, %v2470_v6 }
 0xcd4   : > { %3101 = vrsqrt.f32 %v2473_v7  ;;  %v2474_v10 = vadd.f32 1e-12, %v2472_v9 }
 0xcd6   : > { %3103 = vrsqrt.f32 %v2474_v10 }
 0xcde   : > { %v3102_v12 = vpop.eup %3101 }
 0xcdf   : > { %v2477_v14 = vmul.f32 %v3102_v12, %v2461_v60 }
 0xce0   : > { %v3104_v15 = vpop.eup %3103 }
 0xce1   : > { %v2485_v16 = vmul.f32 %v2778_v13, %v2477_v14  ;;  %v2478_v17 = vmul.f32 %v3104_v15, %v2462_v62 }
 0xce3   : > { %v2486_v19 = vmul.f32 %v2778_v13, %v2478_v17  ;;  %v2493_v20 = vadd.f32 %v2779_v18, %v2485_v16  ;;  %2500 = sbr.rel (%p2780_p1) target bundleno = 3314 (0xcf2), region = 104 }
 0xce5   : > { %v2494_v21 = vadd.f32 %v2779_v18, %v2486_v19 }
 0xce7   : > { %v2495_v22 = vpack.c.bf16 %v2494_v21, %v2493_v20 }
 0xce9   : > { %2496 = vst.msk [vmem:[#allocation2] sm:$0xff] %vm747_vm3, %v2495_v22 }
 0xcf0   : > { %v2501_v23 = vld [vmem:[#allocation2] sm:$0xf]  ;;  %v3105_v24 = vld [vmem:[#allocation2 + $0x4] ss:$0 sps:$4 sm:$0xff]  }
 0xcf1   : > { %2503 = vst.msk [vmem:[#allocation12] sm:$0xf] %vm2502_vm14, %v2501_v23  ;;  %2510 = vst.msk [vmem:[#allocation12 + $0x4] sm:$0xf] %vm2502_vm14, %v3105_v24 }
 0xcf2 PF: > { %p2992_p8 = scmp.eq.s32.totalorder %s3447_s17, 1  ;;  %s3351_s28 = smov [#allocation12]  }
 0xcf3   : > { %s2517_s14 = sshll.u32 %s3351_s28, 4  ;;  %s2518_s14 = int_to_ptr.vmem [resolvable:$true] %s2517_s14 }
 0xcf4   : > { %s3252_s23 = scalar_lea.vmem %s2518_s14, 128  ;;  %p3259_p6 = scmp.lt.s32.totalorder %s2518_s14, %s2518_s14 }
 0xcf5   : > { %p3253_p13 = scmp.ne.s32.totalorder %s2518_s14, %s3252_s23  ;;  %p3260_p5 = scmp.lt.s32.totalorder %s3252_s23, %s3252_s23 }
 0xcf7   : > { %p3254_p11 = pnand %p3253_p13, %p2992_p8  ;;  %p3261_p10 = por %p3260_p5, %p3259_p6 }
 0xcf9   : > { %p3255_p4 = pneg %p3254_p11 }
 0xcfb   : > { %p3262_p12 = pnand %p3261_p10, %p3255_p4 }
 0xcfd   : > { %3265 = shalt.err (!%p3262_p12)
}
 0xcfe   : > { %s4022_s29 = sld [smem:[#allocation28_spill]] }
 0xd04   : > { %s4023_s1 = smov %s4022_s29  ;;  %s3266_s2 = scalar_lea.hbm %s4022_s29, 128 }
 0xd05   : > { %p3267_p0 = scmp.ne.s32.totalorder %s4023_s1, %s3266_s2  ;;  %p3272_p2 = scmp.lt.u32.totalorder %s3266_s2, %s4023_s1 }
 0xd07   : > { %p3268_p3 = pnand %p3267_p0, %p2992_p8 }
 0xd09   : > { %p3269_p7 = pneg %p3268_p3 }
 0xd0b   : > { %p3274_p9 = pnand %p3272_p2, %p3269_p7 }
 0xd0d   : > { %3277 = shalt.err (!%p3274_p9)
}
 0xd0e   : > { %s3352_s20 = smov 4  }
 0xd0f   : > { %2967 = dma.vmem_to_hbm [thread:$0]  (%p2992_p8), %s2518_s14, 128, %s4023_s1, [#allocation6], %s3337_s24, %s3337_s24, %s3352_s20  }
 0xd10   : > { %3307 = dma.done.wait (%p2992_p8), [#allocation6], 128  }
 0xd11   : > { %3309 = vsyncadd (%p2992_p8), [#allocation6], 4294967168 }
 0xd12 PF: > { %s4024_s16 = sld [smem:[#allocation18_spill]]  ;;  %s4025_s26 = sld [smem:[#allocation17_spill]] }
 0xd13   : > { %s4026_s15 = sld [smem:[#allocation19_spill]]  ;;  %s4027_s29 = smov %s3316_s30 }
 0xd18   : > { %p24_p1 = scmp.ge.s32.totalorder %s4024_s16, 4   ;;  %s4028_s30 = smov %s4025_s26 }
 0xd1a   :  { %26 = sbr.rel (!%p24_p1) target bundleno = 14 (0xe), region = 180 }
 0xd21   :  { %2533 = vsyncpa [#allocation5], 1 }
 0xd22   :  { %2535 = vsyncpa [#allocation5 + $0x1], 1 }
 0xd23   :  { %2536 = vsyncpa [#allocation8], 1 }
 0xd24   :  { %2537 = vsyncpa [#allocation6], 1 }
 0xd25   :  { %2539 = vsyncpa [#allocation6 + $0x1], 1 }

</bundles_post_ra>
